<compile_context>
chip_gen: v6e
topology: v6e:2x2x1
jax: 0.10.0
libtpu: 0.0.40
codegen_flags: <defaults>
</compile_context>

<pallas_src>
import functools

import jax
import jax.numpy as jnp
from jax.experimental import pallas as pl
from jax.experimental.pallas import tpu as pltpu


def residual_block2_kernel(
    x_ref,              # (bm, D_in_p)                  matmul dtype
    w1s_ref, b1_ref,    # (D_in_p, H_p + D_out_p) mm,   (1, H_p) f32
    w2_ref, b2_ref,     # (H_p, H_p) mm,                (1, H_p) f32
    w3_ref, b3_ref,     # (H_p, D_out_p) mm,            (1, D_out_p) f32
    bs_ref,             # (1, D_out_p) f32  (skip bias; skip weight is fused into w1s)
    g_ref, bt_ref,      # LayerNorm gamma/beta: (1, D_out_p) f32
    o_ref,              # (bm, D_out_p)
    *, apply_ln, h_p, d_out_valid, matmul_dtype, precision,
):
    xm = x_ref[...]

    # Fused first matmul: x @ [w1 || ws] -> one MXU fill/drain, x read from VMEM once.
    hs = jnp.dot(xm, w1s_ref[...], precision=precision,
                 preferred_element_type=jnp.float32)
    h1 = jnp.maximum(hs[:, :h_p] + b1_ref[...], 0.0)      # dense branch (lane-aligned slice)
    skip = hs[:, h_p:] + bs_ref[...]                       # skip branch

    h2 = jnp.dot(h1.astype(matmul_dtype), w2_ref[...], precision=precision,
                 preferred_element_type=jnp.float32) + b2_ref[...]
    h2 = jnp.maximum(h2, 0.0)
    d = jnp.dot(h2.astype(matmul_dtype), w3_ref[...], precision=precision,
                preferred_element_type=jnp.float32) + b3_ref[...]

    # Dropout(identity) then residual add.
    y = d + skip

    if apply_ln:
        # Single-pass LayerNorm over the *valid* output features (eps=1e-5, biased var).
        # Padded columns of y are exactly zero (zero-padded weights/biases), so plain sums
        # over the padded width are correct.
        inv_n = 1.0 / d_out_valid
        s1 = jnp.sum(y, axis=-1, keepdims=True)
        s2 = jnp.sum(y * y, axis=-1, keepdims=True)
        mean = s1 * inv_n
        var = jnp.maximum(s2 * inv_n - mean * mean, 0.0)
        y = (y - mean) * jax.lax.rsqrt(var + 1e-5) * g_ref[...] + bt_ref[...]

    o_ref[...] = y.astype(o_ref.dtype)


def _round_up(n, m):
    return -(-n // m) * m


def residual_block2(x, params, *, use_layer_norm=True, bm=512,
                    matmul_dtype=jnp.bfloat16):
    """x: [B, D_in] float32. params: dict of f32 weights (see init_params)."""
    B, D_in = x.shape
    H = params["w1"].shape[1]
    D_out = params["w3"].shape[1]

    # Lane-dense padding of all feature dims.
    D_in_p = _round_up(D_in, 128)
    H_p = _round_up(H, 128)
    D_out_p = _round_up(D_out, 128)

    # Balanced batch tiling: tiles of (almost) equal size, <1 sublane group of padding
    # per tile, and no forced multi-step split for small B (serial loop on 1-TC chips).
    n_steps = max(1, -(-B // bm))
    bm_eff = max(8, _round_up(-(-B // n_steps), 8))
    B_p = n_steps * bm_eff
    grid = (n_steps,)

    def pad2(a, r, c):
        return jnp.pad(a, ((0, r - a.shape[0]), (0, c - a.shape[1])))

    f32 = jnp.float32
    exact = jnp.dtype(matmul_dtype) == jnp.dtype(jnp.float32)
    precision = jax.lax.Precision.HIGHEST if exact else None

    # x streamed in the MXU dtype (halves streaming traffic for bf16).
    xp = pad2(x, B_p, D_in_p).astype(matmul_dtype)
    # Fused [w1 || ws] so the x matmul is done once.
    w1s = jnp.concatenate(
        [pad2(params["w1"], D_in_p, H_p), pad2(params["ws"], D_in_p, D_out_p)],
        axis=1).astype(matmul_dtype)
    b1 = pad2(params["b1"], 1, H_p).astype(f32)
    w2 = pad2(params["w2"], H_p, H_p).astype(matmul_dtype)
    b2 = pad2(params["b2"], 1, H_p).astype(f32)
    w3 = pad2(params["w3"], H_p, D_out_p).astype(matmul_dtype)
    b3 = pad2(params["b3"], 1, D_out_p).astype(f32)
    bs = pad2(params["bs"], 1, D_out_p).astype(f32)
    if use_layer_norm:
        gamma = pad2(params["gamma"], 1, D_out_p).astype(f32)
        beta = pad2(params["beta"], 1, D_out_p).astype(f32)
    else:
        gamma = jnp.ones((1, D_out_p), f32)   # passed but unused (LN path not emitted)
        beta = jnp.zeros((1, D_out_p), f32)

    # VMEM budget: weights single-buffered (Buffered(1)), x/out tiles double-buffered,
    # plus f32 activation headroom. Cap by the real chip VMEM capacity.
    mm_isz = jnp.dtype(matmul_dtype).itemsize
    out_isz = jnp.dtype(x.dtype).itemsize
    weight_bytes = (w1s.size + w2.size + w3.size) * mm_isz \
        + (b1.size + b2.size + b3.size + bs.size + gamma.size + beta.size) * 4
    io_bytes = 2 * bm_eff * D_in_p * mm_isz + 2 * bm_eff * D_out_p * out_isz
    act_bytes = bm_eff * (2 * (H_p + D_out_p) + H_p + 3 * D_out_p) * 4
    budget = weight_bytes + io_bytes + act_bytes + (4 << 20)
    try:
        vmem_cap = int(pltpu.get_tpu_info().vmem_capacity_bytes)
    except Exception:
        vmem_cap = 64 * 2**20   # smallest per-TC VMEM across generations (v7x)
    vmem_limit = int(min(int(vmem_cap * 0.85), max(16 * 2**20, budget)))

    flops = 2 * B_p * (D_in_p * (H_p + D_out_p) + H_p * H_p + H_p * D_out_p)
    cost = pl.CostEstimate(
        flops=flops,
        transcendentals=B_p if use_layer_norm else 0,
        bytes_accessed=int(weight_bytes + B_p * D_in_p * mm_isz
                           + B_p * D_out_p * out_isz),
    )

    # Constant-index (grid-invariant) blocks: single-buffered.
    def resident(shape):
        return pl.BlockSpec(shape, lambda i: (0, 0), pipeline_mode=pl.Buffered(1))

    kernel = functools.partial(
        residual_block2_kernel,
        apply_ln=use_layer_norm,
        h_p=H_p,
        d_out_valid=D_out,
        matmul_dtype=matmul_dtype,
        precision=precision,
    )

    out_p = pl.pallas_call(
        kernel,
        out_shape=jax.ShapeDtypeStruct((B_p, D_out_p), x.dtype),
        grid_spec=pltpu.PrefetchScalarGridSpec(
            num_scalar_prefetch=0,
            grid=grid,
            in_specs=[
                pl.BlockSpec((bm_eff, D_in_p), lambda i: (i, 0)),
                resident((D_in_p, H_p + D_out_p)), resident((1, H_p)),
                resident((H_p, H_p)), resident((1, H_p)),
                resident((H_p, D_out_p)), resident((1, D_out_p)),
                resident((1, D_out_p)),
                resident((1, D_out_p)), resident((1, D_out_p)),
            ],
            out_specs=pl.BlockSpec((bm_eff, D_out_p), lambda i: (i, 0)),
        ),
        compiler_params=pltpu.CompilerParams(
            dimension_semantics=("parallel",),
            vmem_limit_bytes=vmem_limit,
        ),
        cost_estimate=cost,
    )(xp, w1s, b1, w2, b2, w3, b3, bs, gamma, beta)

    return out_p[:B, :D_out]


def init_params(key, input_dim, output_dim, hidden_size):
    ks = jax.random.split(key, 8)

    def lin(kw, kb, fan_in, fan_out):
        bound = 1.0 / jnp.sqrt(fan_in)
        w = jax.random.uniform(kw, (fan_in, fan_out), jnp.float32, -bound, bound)
        b = jax.random.uniform(kb, (1, fan_out), jnp.float32, -bound, bound)
        return w, b

    w1, b1 = lin(ks[0], ks[1], input_dim, hidden_size)
    w2, b2 = lin(ks[2], ks[3], hidden_size, hidden_size)
    w3, b3 = lin(ks[4], ks[5], hidden_size, output_dim)
    ws, bs = lin(ks[6], ks[7], input_dim, output_dim)
    return {
        "w1": w1, "b1": b1, "w2": w2, "b2": b2, "w3": w3, "b3": b3,
        "ws": ws, "bs": bs,
        "gamma": jnp.ones((1, output_dim), jnp.float32),
        "beta": jnp.zeros((1, output_dim), jnp.float32),
    }


def reference(x, params, use_layer_norm=True):
    h = jnp.maximum(x @ params["w1"] + params["b1"], 0.0)
    h = jnp.maximum(h @ params["w2"] + params["b2"], 0.0)
    d = h @ params["w3"] + params["b3"]
    y = d + (x @ params["ws"] + params["bs"])
    if use_layer_norm:
        mean = y.mean(-1, keepdims=True)
        var = ((y - mean) ** 2).mean(-1, keepdims=True)
        y = (y - mean) / jnp.sqrt(var + 1e-5) * params["gamma"] + params["beta"]
    return y


if __name__ == "__main__":
    key = jax.random.PRNGKey(0)
    k_x, k_p = jax.random.split(key)

    batch, input_dim, hidden_size, output_dim = 16, 16, 32, 16
    x = jax.random.normal(k_x, (batch, input_dim), jnp.float32)
    params = init_params(k_p, input_dim, output_dim, hidden_size)

    ref_ln = reference(x, params, use_layer_norm=True)
    ref_no_ln = reference(x, params, use_layer_norm=False)

    # 1) f32 MXU path (precision=HIGHEST): exact check.
    out_f32 = jax.block_until_ready(
        residual_block2(x, params, use_layer_norm=True, matmul_dtype=jnp.float32))
    assert out_f32.shape == (batch, output_dim)
    assert jnp.allclose(out_f32, ref_ln, atol=1e-4, rtol=1e-4), "f32 path mismatch"

    # 2) default bf16 MXU path (f32 accumulation): looser check vs f32 reference.
    out_bf16 = jax.block_until_ready(
        residual_block2(x, params, use_layer_norm=True))
    assert out_bf16.shape == (batch, output_dim)
    assert jnp.allclose(out_bf16, ref_ln, atol=3e-2, rtol=3e-2), "bf16 path mismatch"

    # 3) use_layer_norm=False genuinely skips normalization.
    out_no_ln = jax.block_until_ready(
        residual_block2(x, params, use_layer_norm=False, matmul_dtype=jnp.float32))
    assert jnp.allclose(out_no_ln, ref_no_ln, atol=1e-4, rtol=1e-4), "no-LN path mismatch"

    print("KERNEL_OK")
</pallas_src>

<mosaic_0001>
module attributes {stable_mosaic.version = 11 : i64} {
  func.func @residual_block2_kernel(%arg0: i32, %arg1: memref<16x128xf32, #tpu.memory_space<vmem>>, %arg2: memref<128x256xf32, #tpu.memory_space<vmem>>, %arg3: memref<1x128xf32, #tpu.memory_space<vmem>>, %arg4: memref<128x128xf32, #tpu.memory_space<vmem>>, %arg5: memref<1x128xf32, #tpu.memory_space<vmem>>, %arg6: memref<128x128xf32, #tpu.memory_space<vmem>>, %arg7: memref<1x128xf32, #tpu.memory_space<vmem>>, %arg8: memref<1x128xf32, #tpu.memory_space<vmem>>, %arg9: memref<1x128xf32, #tpu.memory_space<vmem>>, %arg10: memref<1x128xf32, #tpu.memory_space<vmem>>, %arg11: memref<16x128xf32, #tpu.memory_space<vmem>>) attributes {dimension_semantics = [#tpu.dimension_semantics<parallel>], iteration_bounds = array<i64: 1>, scalar_prefetch = 0 : i64, scratch_operands = 0 : i64, tpu.core_type = #tpu.core_type<tc>, window_params = [{transform_indices = @transform_0, window_bounds = array<i64: 16, 128>}, {pipeline_mode = #tpu.pipeline_mode<synchronous>, transform_indices = @transform_1, window_bounds = array<i64: 128, 256>}, {pipeline_mode = #tpu.pipeline_mode<synchronous>, transform_indices = @transform_2, window_bounds = array<i64: 1, 128>}, {pipeline_mode = #tpu.pipeline_mode<synchronous>, transform_indices = @transform_3, window_bounds = array<i64: 128, 128>}, {pipeline_mode = #tpu.pipeline_mode<synchronous>, transform_indices = @transform_4, window_bounds = array<i64: 1, 128>}, {pipeline_mode = #tpu.pipeline_mode<synchronous>, transform_indices = @transform_5, window_bounds = array<i64: 128, 128>}, {pipeline_mode = #tpu.pipeline_mode<synchronous>, transform_indices = @transform_6, window_bounds = array<i64: 1, 128>}, {pipeline_mode = #tpu.pipeline_mode<synchronous>, transform_indices = @transform_7, window_bounds = array<i64: 1, 128>}, {pipeline_mode = #tpu.pipeline_mode<synchronous>, transform_indices = @transform_8, window_bounds = array<i64: 1, 128>}, {pipeline_mode = #tpu.pipeline_mode<synchronous>, transform_indices = @transform_9, window_bounds = array<i64: 1, 128>}, {transform_indices = @transform_10, window_bounds = array<i64: 16, 128>}]} {
    %c0 = arith.constant 0 : index
    %c0_0 = arith.constant 0 : index
    %0 = vector.load %arg1[%c0, %c0_0] : memref<16x128xf32, #tpu.memory_space<vmem>>, vector<16x128xf32>
    %c0_1 = arith.constant 0 : index
    %c0_2 = arith.constant 0 : index
    %1 = vector.load %arg2[%c0_1, %c0_2] : memref<128x256xf32, #tpu.memory_space<vmem>>, vector<128x256xf32>
    %cst = arith.constant dense<0.000000e+00> : vector<16x256xf32>
    %2 = tpu.matmul %0, %1, %cst {dimension_numbers = #tpu.dot_dimension_numbers<[1], [0], [0], [1], [0, 0, 1, 1], [], []>, precision = #tpu.contract_precision<fp32>} : vector<16x128xf32>, vector<128x256xf32>, vector<16x256xf32> -> vector<16x256xf32>
    %3 = vector.extract_strided_slice %2 {offsets = [0, 0], sizes = [16, 128], strides = [1, 1]} : vector<16x256xf32> to vector<16x128xf32>
    %c0_3 = arith.constant 0 : index
    %c0_4 = arith.constant 0 : index
    %4 = vector.load %arg3[%c0_3, %c0_4] : memref<1x128xf32, #tpu.memory_space<vmem>>, vector<1x128xf32>
    %5 = vector.broadcast %4 : vector<1x128xf32> to vector<16x128xf32>
    %6 = arith.addf %3, %5 : vector<16x128xf32>
    %cst_5 = arith.constant 0.000000e+00 : f32
    %7 = vector.broadcast %cst_5 : f32 to vector<16x128xf32>
    %8 = arith.maximumf %6, %7 : vector<16x128xf32>
    %9 = vector.extract_strided_slice %2 {offsets = [0, 128], sizes = [16, 128], strides = [1, 1]} : vector<16x256xf32> to vector<16x128xf32>
    %c0_6 = arith.constant 0 : index
    %c0_7 = arith.constant 0 : index
    %10 = vector.load %arg8[%c0_6, %c0_7] : memref<1x128xf32, #tpu.memory_space<vmem>>, vector<1x128xf32>
    %11 = vector.broadcast %10 : vector<1x128xf32> to vector<16x128xf32>
    %12 = arith.addf %9, %11 : vector<16x128xf32>
    %c0_8 = arith.constant 0 : index
    %c0_9 = arith.constant 0 : index
    %13 = vector.load %arg4[%c0_8, %c0_9] : memref<128x128xf32, #tpu.memory_space<vmem>>, vector<128x128xf32>
    %cst_10 = arith.constant dense<0.000000e+00> : vector<16x128xf32>
    %14 = tpu.matmul %8, %13, %cst_10 {dimension_numbers = #tpu.dot_dimension_numbers<[1], [0], [0], [1], [0, 0, 1, 1], [], []>, precision = #tpu.contract_precision<fp32>} : vector<16x128xf32>, vector<128x128xf32>, vector<16x128xf32> -> vector<16x128xf32>
    %c0_11 = arith.constant 0 : index
    %c0_12 = arith.constant 0 : index
    %15 = vector.load %arg5[%c0_11, %c0_12] : memref<1x128xf32, #tpu.memory_space<vmem>>, vector<1x128xf32>
    %16 = vector.broadcast %15 : vector<1x128xf32> to vector<16x128xf32>
    %17 = arith.addf %14, %16 : vector<16x128xf32>
    %cst_13 = arith.constant 0.000000e+00 : f32
    %18 = vector.broadcast %cst_13 : f32 to vector<16x128xf32>
    %19 = arith.maximumf %17, %18 : vector<16x128xf32>
    %c0_14 = arith.constant 0 : index
    %c0_15 = arith.constant 0 : index
    %20 = vector.load %arg6[%c0_14, %c0_15] : memref<128x128xf32, #tpu.memory_space<vmem>>, vector<128x128xf32>
    %cst_16 = arith.constant dense<0.000000e+00> : vector<16x128xf32>
    %21 = tpu.matmul %19, %20, %cst_16 {dimension_numbers = #tpu.dot_dimension_numbers<[1], [0], [0], [1], [0, 0, 1, 1], [], []>, precision = #tpu.contract_precision<fp32>} : vector<16x128xf32>, vector<128x128xf32>, vector<16x128xf32> -> vector<16x128xf32>
    %c0_17 = arith.constant 0 : index
    %c0_18 = arith.constant 0 : index
    %22 = vector.load %arg7[%c0_17, %c0_18] : memref<1x128xf32, #tpu.memory_space<vmem>>, vector<1x128xf32>
    %23 = vector.broadcast %22 : vector<1x128xf32> to vector<16x128xf32>
    %24 = arith.addf %21, %23 : vector<16x128xf32>
    %25 = arith.addf %24, %12 : vector<16x128xf32>
    %cst_19 = arith.constant dense<0.000000e+00> : vector<16xf32>
    %26 = vector.multi_reduction <add>, %25, %cst_19 [1] : vector<16x128xf32> to vector<16xf32>
    %27 = vector.shape_cast %26 : vector<16xf32> to vector<16x1xf32>
    %28 = arith.mulf %25, %25 : vector<16x128xf32>
    %cst_20 = arith.constant dense<0.000000e+00> : vector<16xf32>
    %29 = vector.multi_reduction <add>, %28, %cst_20 [1] : vector<16x128xf32> to vector<16xf32>
    %30 = vector.shape_cast %29 : vector<16xf32> to vector<16x1xf32>
    %cst_21 = arith.constant 6.250000e-02 : f32
    %31 = vector.broadcast %cst_21 : f32 to vector<16x1xf32>
    %32 = arith.mulf %27, %31 : vector<16x1xf32>
    %cst_22 = arith.constant 6.250000e-02 : f32
    %33 = vector.broadcast %cst_22 : f32 to vector<16x1xf32>
    %34 = arith.mulf %30, %33 : vector<16x1xf32>
    %35 = arith.mulf %32, %32 : vector<16x1xf32>
    %36 = arith.subf %34, %35 : vector<16x1xf32>
    %cst_23 = arith.constant 0.000000e+00 : f32
    %37 = vector.broadcast %cst_23 : f32 to vector<16x1xf32>
    %38 = arith.maximumf %36, %37 : vector<16x1xf32>
    %39 = vector.broadcast %32 : vector<16x1xf32> to vector<16x128xf32>
    %40 = arith.subf %25, %39 : vector<16x128xf32>
    %cst_24 = arith.constant 9.99999974E-6 : f32
    %41 = vector.broadcast %cst_24 : f32 to vector<16x1xf32>
    %42 = arith.addf %38, %41 : vector<16x1xf32>
    %43 = math.rsqrt %42 : vector<16x1xf32>
    %44 = vector.broadcast %43 : vector<16x1xf32> to vector<16x128xf32>
    %45 = arith.mulf %40, %44 : vector<16x128xf32>
    %c0_25 = arith.constant 0 : index
    %c0_26 = arith.constant 0 : index
    %46 = vector.load %arg9[%c0_25, %c0_26] : memref<1x128xf32, #tpu.memory_space<vmem>>, vector<1x128xf32>
    %47 = vector.broadcast %46 : vector<1x128xf32> to vector<16x128xf32>
    %48 = arith.mulf %45, %47 : vector<16x128xf32>
    %c0_27 = arith.constant 0 : index
    %c0_28 = arith.constant 0 : index
    %49 = vector.load %arg10[%c0_27, %c0_28] : memref<1x128xf32, #tpu.memory_space<vmem>>, vector<1x128xf32>
    %50 = vector.broadcast %49 : vector<1x128xf32> to vector<16x128xf32>
    %51 = arith.addf %48, %50 : vector<16x128xf32>
    %c0_29 = arith.constant 0 : index
    %c0_30 = arith.constant 0 : index
    %52 = vector.load %arg11[%c0_29, %c0_30] : memref<16x128xf32, #tpu.memory_space<vmem>>, vector<16x128xf32>
    tpu.vector_store %arg11[%c0_29, %c0_30], %51 {strides = array<i32>} : memref<16x128xf32, #tpu.memory_space<vmem>>, vector<16x128xf32>,
    return
  }
  func.func @transform_0(%arg0: i32) -> (i32, i32) {
    %c0_i32 = arith.constant 0 : i32
    %c0_i32_0 = arith.constant 0 : i32
    return %arg0, %c0_i32 : i32, i32
  }
  func.func @transform_1(%arg0: i32) -> (i32, i32) {
    %c0_i32 = arith.constant 0 : i32
    %c0_i32_0 = arith.constant 0 : i32
    %c0_i32_1 = arith.constant 0 : i32
    return %c0_i32, %c0_i32_0 : i32, i32
  }
  func.func @transform_2(%arg0: i32) -> (i32, i32) {
    %c0_i32 = arith.constant 0 : i32
    %c0_i32_0 = arith.constant 0 : i32
    %c0_i32_1 = arith.constant 0 : i32
    return %c0_i32, %c0_i32_0 : i32, i32
  }
  func.func @transform_3(%arg0: i32) -> (i32, i32) {
    %c0_i32 = arith.constant 0 : i32
    %c0_i32_0 = arith.constant 0 : i32
    %c0_i32_1 = arith.constant 0 : i32
    return %c0_i32, %c0_i32_0 : i32, i32
  }
  func.func @transform_4(%arg0: i32) -> (i32, i32) {
    %c0_i32 = arith.constant 0 : i32
    %c0_i32_0 = arith.constant 0 : i32
    %c0_i32_1 = arith.constant 0 : i32
    return %c0_i32, %c0_i32_0 : i32, i32
  }
  func.func @transform_5(%arg0: i32) -> (i32, i32) {
    %c0_i32 = arith.constant 0 : i32
    %c0_i32_0 = arith.constant 0 : i32
    %c0_i32_1 = arith.constant 0 : i32
    return %c0_i32, %c0_i32_0 : i32, i32
  }
  func.func @transform_6(%arg0: i32) -> (i32, i32) {
    %c0_i32 = arith.constant 0 : i32
    %c0_i32_0 = arith.constant 0 : i32
    %c0_i32_1 = arith.constant 0 : i32
    return %c0_i32, %c0_i32_0 : i32, i32
  }
  func.func @transform_7(%arg0: i32) -> (i32, i32) {
    %c0_i32 = arith.constant 0 : i32
    %c0_i32_0 = arith.constant 0 : i32
    %c0_i32_1 = arith.constant 0 : i32
    return %c0_i32, %c0_i32_0 : i32, i32
  }
  func.func @transform_8(%arg0: i32) -> (i32, i32) {
    %c0_i32 = arith.constant 0 : i32
    %c0_i32_0 = arith.constant 0 : i32
    %c0_i32_1 = arith.constant 0 : i32
    return %c0_i32, %c0_i32_0 : i32, i32
  }
  func.func @transform_9(%arg0: i32) -> (i32, i32) {
    %c0_i32 = arith.constant 0 : i32
    %c0_i32_0 = arith.constant 0 : i32
    %c0_i32_1 = arith.constant 0 : i32
    return %c0_i32, %c0_i32_0 : i32, i32
  }
  func.func @transform_10(%arg0: i32) -> (i32, i32) {
    %c0_i32 = arith.constant 0 : i32
    %c0_i32_0 = arith.constant 0 : i32
    return %arg0, %c0_i32 : i32, i32
  }
}

</mosaic_0001>

<bundles_post_ra>
// kernel: tpu_custom_call.1
= control target key start
LH: loop header
LB: loop body
LE: loop exit
PB: predicated region body
PF: predicated region fallthrough
CT: control target
= control target key end

     0   :  { %15 = vsyncpa [#allocation3], 0  ;;  %s4712_s0 = inlined_call_operand.hbm [shape: f32[16,128], index: 0, kind: input, shape index: {}]   ;;  %s4713_s1 = inlined_call_operand.hbm [shape: f32[128,256], index: 1, kind: input, shape index: {}]   ;;  %s4714_s2 = inlined_call_operand.vmem [shape: f32[1,128], index: 2, kind: input, shape index: {}]   ;;  %s4715_s3 = inlined_call_operand.hbm [shape: f32[128,128], index: 3, kind: input, shape index: {}]   ;;  %s4716_s4 = inlined_call_operand.vmem [shape: f32[1,128], index: 4, kind: input, shape index: {}]   ;;  %s4717_s5 = inlined_call_operand.hbm [shape: f32[128,128], index: 5, kind: input, shape index: {}]   ;;  %s4718_s6 = inlined_call_operand.vmem [shape: f32[1,128], index: 6, kind: input, shape index: {}]   ;;  %s4719_s7 = inlined_call_operand.vmem [shape: f32[1,128], index: 7, kind: input, shape index: {}]   ;;  %s4720_s8 = inlined_call_operand.vmem [shape: f32[1,128], index: 8, kind: input, shape index: {}]   ;;  %s4721_s9 = inlined_call_operand.vmem [shape: f32[1,128], index: 9, kind: input, shape index: {}]   ;;  %s4722_s10 = inlined_call_operand.hbm [shape: f32[16,128], index: 10, kind: output, shape index: {}]  }
   0x1   :  { %16 = vsyncpa [#allocation6], 0 }
   0x2   :  { %17 = vsyncpa [#allocation9], 0 }
   0x3   :  { %18 = vsyncpa [#allocation4], 0  ;;  %s3298_s13 = smov [#allocation5]  }
   0x4   :  { %s36_s14 = sshll.u32 %s3298_s13, 4  ;;  %s37_s14 = int_to_ptr.vmem [resolvable:$true] %s36_s14 }
   0x5   :  { %s3198_s15 = scalar_lea.vmem %s37_s14, 4096  ;;  %p3203_p1 = scmp.lt.s32.totalorder %s37_s14, %s37_s14 }
   0x6   :  { %p3199_p0 = scmp.ne.s32.totalorder %s37_s14, %s3198_s15  ;;  %p3204_p2 = scmp.lt.s32.totalorder %s3198_s15, %s3198_s15 }
   0x8   :  { %p3205_p3 = por %p3204_p2, %p3203_p1 }
   0xa   :  { %p3206_p4 = pnand %p3205_p3, %p3199_p0 }
   0xc   :  { %3209 = shalt.err (!%p3206_p4)
}
   0xd   :  { %s3299_s16 = smov 256   ;;  %s3300_s17 = smov 16  }
   0xe   :  { %42 = dma.hbm_to_vmem [thread:$0]  %s4713_s1, 4096, %s37_s14, [#allocation6], %s3299_s16, %s3299_s16, %s3300_s17  }
   0xf   :  { %s3301_s20 = smov [#allocation2]  }
  0x10   :  { %s24_s21 = sshll.u32 %s3301_s20, 4  ;;  %s25_s21 = int_to_ptr.vmem [resolvable:$true] %s24_s21 }
  0x11   :  { %s3218_s22 = scalar_lea.vmem %s25_s21, 256  ;;  %p3223_p6 = scmp.lt.s32.totalorder %s25_s21, %s25_s21 }
  0x12   :  { %p3219_p5 = scmp.ne.s32.totalorder %s25_s21, %s3218_s22  ;;  %p3224_p7 = scmp.lt.s32.totalorder %s3218_s22, %s3218_s22 }
  0x14   :  { %p3225_p8 = por %p3224_p7, %p3223_p6 }
  0x16   :  { %p3226_p9 = pnand %p3225_p8, %p3219_p5 }
  0x18   :  { %3229 = shalt.err (!%p3226_p9)
}
  0x19   :  { %s3302_s23 = smov 128   ;;  %s3303_s24 = smov 8  }
  0x1a   :  { %30 = dma.hbm_to_vmem [thread:$0]  %s4712_s0, 256, %s25_s21, [#allocation3], %s3302_s23, %s3302_s23, %s3303_s24  }
  0x1b   :  { %s3304_s1 = smov [#allocation7]   ;;  %s3305_s28 = smov [#allocation8]  }
  0x1c   :  { %s50_s27 = sshll.u32 %s3304_s1, 4  ;;  %s64_s29 = sshll.u32 %s3305_s28, 4  ;;  %s51_s27 = int_to_ptr.vmem [resolvable:$true] %s50_s27  ;;  %s65_s29 = int_to_ptr.vmem [resolvable:$true] %s64_s29 }
  0x1d   :  { %s3238_s30 = scalar_lea.vmem %s51_s27, 2048  ;;  %p3243_p11 = scmp.lt.s32.totalorder %s51_s27, %s51_s27 }
  0x1e   :  { %p3239_p10 = scmp.ne.s32.totalorder %s51_s27, %s3238_s30  ;;  %p3244_p12 = scmp.lt.s32.totalorder %s3238_s30, %s3238_s30 }
  0x20   :  { %p3245_p13 = por %p3244_p12, %p3243_p11 }
  0x22   :  { %p3246_p0 = pnand %p3245_p13, %p3239_p10 }
  0x24   :  { %3249 = shalt.err (!%p3246_p0)
}
  0x25   :  { %56 = dma.hbm_to_vmem [thread:$0]  %s4715_s3, 2048, %s51_s27, [#allocation6], %s3302_s23, %s3302_s23, %s3303_s24  }
  0x26   :  { %s3258_s0 = scalar_lea.vmem %s65_s29, 2048  ;;  %p3263_p2 = scmp.lt.s32.totalorder %s65_s29, %s65_s29 }
  0x27   :  { %p3259_p1 = scmp.ne.s32.totalorder %s65_s29, %s3258_s0  ;;  %p3264_p3 = scmp.lt.s32.totalorder %s3258_s0, %s3258_s0 }
  0x29   :  { %p3265_p4 = por %p3264_p3, %p3263_p2 }
  0x2b   :  { %p3266_p5 = pnand %p3265_p4, %p3259_p1 }
  0x2d   :  { %3269 = shalt.err (!%p3266_p5)
}
  0x2e   :  { %70 = dma.hbm_to_vmem [thread:$0]  %s4717_s5, 2048, %s65_s29, [#allocation9], %s3302_s23, %s3302_s23, %s3303_s24  }
  0x2f   :  { %3290 = dma.done.wait [#allocation3], 256  }
  0x30   :  { %3291 = vsyncadd [#allocation3], 4294967040 }
  0x31   :  { %3292 = dma.done.wait [#allocation6], 6144  }
  0x32   :  { %3293 = vsyncadd [#allocation6], 4294961152 }
  0x33   :  { %3294 = dma.done.wait [#allocation9], 2048  }
  0x34   :  { %3295 = vsyncadd [#allocation9], 4294965248  ;;  %v4737_v0 = vmov 0.0   ;;  %v124_v1 = vld [vmem:[#allocation5 + $0xf8] sm:$0xff]  ;;  %v123_v2 = vld [vmem:[#allocation5 + $0xf0] sm:$0xff]  ;;  %s3307_s21 = smov [#allocation10]  }
  0x35   :  { %221 = vmatprep.mubr.f32.mxu0 %v4737_v0  ;;  %468 = vmatprep.mubr.f32.mxu1 %v4737_v0  ;;  %v122_v3 = vld [vmem:[#allocation5 + $0xe8] sm:$0xff]  ;;  %v3386_v4 = vand.u32 4294901760, %v124_v1  ;;  %v3388_v5 = vand.u32 4294901760, %v123_v2  ;;  %v121_v7 = vld [vmem:[#allocation5 + $0xe0] sm:$0xff]  ;;  %v120_v8 = vld [vmem:[#allocation5 + $0xd8] sm:$0xff]  ;;  %s2520_s22 = sshll.u32 %s3307_s21, 4  ;;  %s2521_s22 = int_to_ptr.vmem [resolvable:$true] %s2520_s22 }
  0x36   :  { %v3390_v6 = vand.u32 4294901760, %v122_v3  ;;  %v119_v9 = vld [vmem:[#allocation5 + $0xd0] sm:$0xff]  ;;  %v3392_v10 = vand.u32 4294901760, %v121_v7  ;;  %v3394_v11 = vand.u32 4294901760, %v120_v8  ;;  %v118_v13 = vld [vmem:[#allocation5 + $0xc8] sm:$0xff]  ;;  %v117_v14 = vld [vmem:[#allocation5 + $0xc0] sm:$0xff]  ;;  %p3275_p7 = scmp.lt.s32.totalorder %s2521_s22, %s2521_s22 }
  0x37   :  { %v3396_v12 = vand.u32 4294901760, %v119_v9  ;;  %v116_v15 = vld [vmem:[#allocation5 + $0xb8] sm:$0xff]  ;;  %126 = vmatprep.subr.mxu0 %v3386_v4  ;;  %v3399_v16 = vand.u32 4294901760, %v118_v13  ;;  %v3401_v17 = vand.u32 4294901760, %v117_v14  ;;  %v3406_v19 = vsub.f32 %v124_v1, %v3386_v4  ;;  %v3408_v20 = vld [vmem:[#allocation5 + $0xb0] sm:$0xff]  ;;  %v3410_v21 = vld [vmem:[#allocation5 + $0xa8] sm:$0xff] }
  0x38   :  { %v3403_v18 = vand.u32 4294901760, %v116_v15  ;;  %v3412_v22 = vld [vmem:[#allocation5 + $0xa0] sm:$0xff]  ;;  %128 = vmatpush1.msra.mxu0 %v3388_v5  ;;  %v3416_v23 = vand.u32 4294901760, %v3408_v20  ;;  %v3419_v24 = vsub.f32 %v123_v2, %v3388_v5  ;;  %v3422_v25 = vand.u32 4294901760, %v3410_v21  ;;  %v3427_v27 = vld [vmem:[#allocation5 + $0x98] sm:$0xff]  ;;  %v3429_v28 = vld [vmem:[#allocation5 + $0x90] sm:$0xff] }
  0x39   :  { %v3425_v26 = vsub.f32 %v122_v3, %v3390_v6  ;;  %v3431_v29 = vld [vmem:[#allocation5 + $0x88] sm:$0xff]  ;;  %130 = vmatprep.subr.mxu0 %v3390_v6  ;;  %v4735_v30 = vand.u32 4294901760, %v3406_v19  ;;  %v3436_v31 = vand.u32 4294901760, %v3412_v22  ;;  %v3439_v32 = vsub.f32 %v121_v7, %v3392_v10  ;;  %v3453_v38 = vld [vmem:[#allocation5 + $0x80] sm:$0xff]  ;;  %v3477_v47 = vld [vmem:[#allocation5 + $0x78] sm:$0xff]  ;;  %s3270_s25 = scalar_lea.vmem %s2521_s22, 256 }
  0x3a   :  { %v3442_v33 = vand.u32 4294901760, %v3427_v27  ;;  %132 = vmatpush1.msra.mxu0 %v3392_v10  ;;  %v4734_v34 = vand.u32 4294901760, %v3419_v24  ;;  %v3448_v36 = vsub.f32 %v120_v8, %v3394_v11  ;;  %v3451_v37 = vand.u32 4294901760, %v3429_v28  ;;  %v3487_v52 = vld [vmem:[#allocation5 + $0x70] sm:$0xff]  ;;  %v3494_v57 = vld [vmem:[#allocation5 + $0x68] sm:$0xff]  ;;  %v3506_v62 = vld [vmem:[#allocation5 + $0x60] sm:$0xff]  ;;  %p3271_p6 = scmp.ne.s32.totalorder %s2521_s22, %s3270_s25  ;;  %p3276_p8 = scmp.lt.s32.totalorder %s3270_s25, %s3270_s25 }
  0x3b   :  { %4830 = vst [vmem:[#allocation15_spill] sm:$0xff] %v3436_v31  ;;  %v4732_v35 = vand.u32 4294901760, %v3425_v26  ;;  %134 = vmatprep.subr.mxu0 %v3394_v11  ;;  %v247_v39 = vsub.f32 %v3406_v19, %v4735_v30  ;;  %v4730_v40 = vand.u32 4294901760, %v3439_v32  ;;  %v3461_v41 = vsub.f32 %v119_v9, %v3396_v12  ;;  %v3518_v7 = vld [vmem:[#allocation5 + $0x58] sm:$0xff] }
  0x3c   :  { %4831 = vst [vmem:[#allocation16_spill] sm:$0xff] %v3442_v33  ;;  %4832 = vst [vmem:[#allocation17_spill] sm:$0xff] %v3451_v37  ;;  %v3464_v42 = vand.u32 4294901760, %v3431_v29  ;;  %136 = vmatpush1.msra.mxu0 %v3396_v12  ;;  %v253_v43 = vsub.f32 %v3419_v24, %v4734_v34  ;;  %v4729_v45 = vand.u32 4294901760, %v3448_v36  ;;  %v3475_v46 = vsub.f32 %v118_v13, %v3399_v16  ;;  %v3619_v34 = vld [vmem:[#allocation5 + $0x20] sm:$0xff]  ;;  %p3277_p9 = por %p3276_p8, %p3275_p7 }
  0x3d   :  { %v259_v44 = vsub.f32 %v3425_v26, %v4732_v35  ;;  %138 = vmatprep.subr.mxu0 %v3399_v16  ;;  %v248_v48 = vand.u32 4294901760, %v247_v39  ;;  %v265_v49 = vsub.f32 %v3439_v32, %v4730_v40  ;;  %v4727_v50 = vand.u32 4294901760, %v3461_v41  ;;  %v3609_v35 = vld [vmem:[#allocation5 + $0x28] sm:$0xff] }
  0x3e   :  { %4833 = vst [vmem:[#allocation18_spill] sm:$0xff] %v3464_v42  ;;  %v3485_v51 = vand.u32 4294901760, %v3453_v38  ;;  %140 = vmatpush1.msra.mxu0 %v3401_v17  ;;  %v254_v53 = vand.u32 4294901760, %v253_v43  ;;  %v271_v55 = vsub.f32 %v3448_v36, %v4729_v45  ;;  %v4725_v56 = vand.u32 4294901760, %v3475_v46  ;;  %v3596_v45 = vld [vmem:[#allocation5 + $0x30] sm:$0xff]  ;;  %p3278_p10 = pnand %p3277_p9, %p3271_p6 }
  0x3f   :  { %v260_v54 = vand.u32 4294901760, %v259_v44  ;;  %142 = vmatprep.subr.mxu0 %v3403_v18  ;;  %249 = vmatprep.subr.mxu1 %v248_v48  ;;  %v266_v58 = vand.u32 4294901760, %v265_v49  ;;  %v277_v59 = vsub.f32 %v3461_v41, %v4727_v50  ;;  %v3501_v60 = vsub.f32 %v117_v14, %v3401_v17 }
  0x40   :  { %4834 = vst [vmem:[#allocation19_spill] sm:$0xff] %v3485_v51  ;;  %v3504_v61 = vand.u32 4294901760, %v3477_v47  ;;  %144 = vmatpush1.msra.mxu0 %v3416_v23  ;;  %255 = vmatpush1.msra.mxu1 %v254_v53  ;;  %v272_v63 = vand.u32 4294901760, %v271_v55  ;;  %v283_v1 = vsub.f32 %v3475_v46, %v4725_v56  ;;  %v3513_v2 = vsub.f32 %v116_v15, %v3403_v18  ;;  %v3529_v15 = vld [vmem:[#allocation5 + $0x50] sm:$0xff] }
  0x41   :  { %v3516_v3 = vand.u32 4294901760, %v3487_v52  ;;  %146 = vmatprep.subr.mxu0 %v3422_v25  ;;  %261 = vmatprep.subr.mxu1 %v260_v54  ;;  %v278_v8 = vand.u32 4294901760, %v277_v59  ;;  %v4724_v9 = vand.u32 4294901760, %v3501_v60  ;;  %v3524_v13 = vsub.f32 %v3408_v20, %v3416_v23 }
  0x42   :  { %4835 = vst [vmem:[#allocation20_spill] sm:$0xff] %v3504_v61  ;;  %v3527_v14 = vand.u32 4294901760, %v3494_v57  ;;  %148 = vmatpush1.msra.mxu0 %v3436_v31  ;;  %267 = vmatpush1.msra.mxu1 %v266_v58  ;;  %v284_v39 = vand.u32 4294901760, %v283_v1  ;;  %v4723_v43 = vand.u32 4294901760, %v3513_v2  ;;  %v3535_v44 = vsub.f32 %v3410_v21, %v3422_v25  ;;  %v3552_v21 = vld [vmem:[#allocation5 + $0x48] sm:$0xff] }
  0x43   :  { %4836 = vst [vmem:[#allocation21_spill] sm:$0xff] %v3516_v3  ;;  %v3538_v48 = vand.u32 4294901760, %v3506_v62  ;;  %150 = vmatprep.subr.mxu0 %v3442_v33  ;;  %273 = vmatprep.subr.mxu1 %v272_v63  ;;  %v289_v20 = vsub.f32 %v3501_v60, %v4724_v9  ;;  %v4726_v49 = vand.u32 4294901760, %v3524_v13  ;;  %v3547_v53 = vsub.f32 %v3412_v22, %v3436_v31  ;;  %v3575_v9 = vld [vmem:[#allocation5 + $0x40] sm:$0xff] }
  0x44   :  { %4837 = vst [vmem:[#allocation22_spill] sm:$0xff] %v3527_v14  ;;  %v3550_v54 = vand.u32 4294901760, %v3518_v7  ;;  %152 = vmatpush1.msra.mxu0 %v3451_v37  ;;  %279 = vmatpush1.msra.mxu1 %v278_v8  ;;  %v295_v55 = vsub.f32 %v3513_v2, %v4723_v43  ;;  %v4728_v58 = vand.u32 4294901760, %v3535_v44  ;;  %v3561_v59 = vsub.f32 %v3427_v27, %v3442_v33  ;;  %v91_v33 = vld [vmem:[#allocation2] sm:$0xff] }
  0x45   :  { %4838 = vst [vmem:[#allocation23_spill] sm:$0xff] %v3538_v48  ;;  %v3564_v22 = vand.u32 4294901760, %v3529_v15  ;;  %154 = vmatprep.subr.mxu0 %v3464_v42  ;;  %285 = vmatprep.subr.mxu1 %v284_v39  ;;  %v290_v63 = vand.u32 4294901760, %v289_v20  ;;  %v301_v1 = vsub.f32 %v3524_v13, %v4726_v49  ;;  %v4731_v8 = vand.u32 4294901760, %v3547_v53  ;;  %v3585_v49 = vld [vmem:[#allocation5 + $0x38] sm:$0xff] }
  0x46   :  { %4839 = vst [vmem:[#allocation24_spill] sm:$0xff] %v3550_v54  ;;  %v3573_v43 = vsub.f32 %v3429_v28, %v3451_v37  ;;  %156 = vmatpush1.msra.mxu0 %v3485_v51  ;;  %v296_v27 = vand.u32 4294901760, %v295_v55  ;;  %v307_v39 = vsub.f32 %v3535_v44, %v4728_v58  ;;  %v4733_v20 = vand.u32 4294901760, %v3561_v59 }
  0x47   :  { %4840 = vst [vmem:[#allocation25_spill] sm:$0xff] %v3564_v22  ;;  %v3583_v56 = vand.u32 4294901760, %v3552_v21  ;;  %291 = vmatpush1.msra.mxu1 %v290_v63  ;;  %158 = vmatprep.subr.mxu0 %v3504_v61  ;;  %v302_v28 = vand.u32 4294901760, %v301_v1  ;;  %v313_v50 = vsub.f32 %v3547_v53, %v4731_v8  ;;  %v3594_v58 = vsub.f32 %v3431_v29, %v3464_v42 }
  0x48   :  { %v4736_v55 = vand.u32 4294901760, %v3573_v43  ;;  %297 = vmatprep.subr.mxu1 %v296_v27  ;;  %160 = vmatpush1.msra.mxu0 %v3516_v3  ;;  %v308_v40 = vand.u32 4294901760, %v307_v39  ;;  %v319_v63 = vsub.f32 %v3561_v59, %v4733_v20  ;;  %v3603_v1 = vand.u32 4294901760, %v3575_v9 }
  0x49   :  { %4841 = vst [vmem:[#allocation26_spill] sm:$0xff] %v3583_v56  ;;  %v3607_v8 = vsub.f32 %v3453_v38, %v3485_v51  ;;  %303 = vmatpush1.msra.mxu1 %v302_v28  ;;  %162 = vmatprep.subr.mxu0 %v3527_v14  ;;  %v314_v29 = vand.u32 4294901760, %v313_v50  ;;  %v4741_v39 = vand.u32 4294901760, %v3594_v58  ;;  %v3617_v20 = vand.u32 4294901760, %v3585_v49 }
  0x4a   :  { %4842 = vst [vmem:[#allocation27_spill] sm:$0xff] %v3603_v1  ;;  %v325_v27 = vsub.f32 %v3573_v43, %v4736_v55  ;;  %309 = vmatprep.subr.mxu1 %v308_v40  ;;  %164 = vmatpush1.msra.mxu0 %v3538_v48  ;;  %v320_v38 = vand.u32 4294901760, %v319_v63  ;;  %v3625_v50 = vsub.f32 %v3477_v47, %v3504_v61  ;;  %v3628_v30 = vand.u32 4294901760, %v3596_v45  ;;  %v3630_v55 = vld [vmem:[#allocation5 + $0x18] sm:$0xff] }
  0x4b   :  { %4843 = vst [vmem:[#allocation28_spill] sm:$0xff] %v3617_v20  ;;  %v4744_v28 = vand.u32 4294901760, %v3607_v8  ;;  %315 = vmatpush1.msra.mxu1 %v314_v29  ;;  %166 = vmatprep.subr.mxu0 %v3550_v54  ;;  %v331_v40 = vsub.f32 %v3594_v58, %v4741_v39  ;;  %v3638_v63 = vsub.f32 %v3487_v52, %v3516_v3  ;;  %v3641_v47 = vand.u32 4294901760, %v3609_v35  ;;  %v3655_v52 = vld [vmem:[#allocation5 + $0x10] sm:$0xff] }
  0x4c   :  { %4844 = vst [vmem:[#allocation29_spill] sm:$0xff] %v3628_v30  ;;  %v326_v0 = vand.u32 4294901760, %v325_v27  ;;  %321 = vmatprep.subr.mxu1 %v320_v38  ;;  %168 = vmatpush1.msra.mxu0 %v3564_v22  ;;  %v3650_v61 = vsub.f32 %v3494_v57, %v3527_v14  ;;  %v3653_v39 = vand.u32 4294901760, %v3619_v34  ;;  %v3664_v27 = vand.u32 4294901760, %v3630_v55  ;;  %v3666_v57 = vld [vmem:[#allocation5 + $0x8] sm:$0xff] }
  0x4d   :  { %4845 = vst [vmem:[#allocation30_spill] sm:$0xff] %v3641_v47  ;;  %v337_v29 = vsub.f32 %v3607_v8, %v4744_v28  ;;  %170 = vmatprep.subr.mxu0 %v3583_v56  ;;  %v332_v38 = vand.u32 4294901760, %v331_v40  ;;  %v3661_v28 = vsub.f32 %v3506_v62, %v3538_v48  ;;  %v4847_v51 = vand.u32 4294901760, %v3625_v50  ;;  %v3689_v40 = vld [vmem:[#allocation5] sm:$0xff] }
  0x4e   :  { %4846 = vst [vmem:[#allocation31_spill] sm:$0xff] %v3653_v39  ;;  %327 = vmatpush1.msra.mxu1 %v326_v0  ;;  %172 = vmatpush1.msra.mxu0 %v3603_v1  ;;  %v3675_v3 = vsub.f32 %v3518_v7, %v3550_v54  ;;  %v4848_v62 = vand.u32 4294901760, %v3638_v63  ;;  %v3697_v42 = vand.u32 4294901760, %v3666_v57  ;;  %v3713_v31 = vand.u32 4294901760, %v3689_v40 }
  0x4f   :  { %v338_v14 = vand.u32 4294901760, %v337_v29  ;;  %v343_v0 = vsub.f32 %v3625_v50, %v4847_v51  ;;  %333 = vmatprep.subr.mxu1 %v332_v38  ;;  %174 = vmatprep.subr.mxu0 %v3617_v20  ;;  %v3683_v29 = vand.u32 4294901760, %v3655_v52  ;;  %v3687_v51 = vsub.f32 %v3529_v15, %v3564_v22 }
  0x50   :  { %v349_v48 = vsub.f32 %v3638_v63, %v4848_v62  ;;  %176 = vmatpush1.msra.mxu0 %v3628_v30  ;;  %v4850_v38 = vand.u32 4294901760, %v3650_v61  ;;  %v4763_v62 = vand.u32 4294901760, %v3675_v3  ;;  %v4851_v15 = vand.u32 4294901760, %v3661_v28 }
  0x51   :  { %4849 = vst [vmem:[#allocation32_spill] sm:$0xff] %v3683_v29  ;;  %339 = vmatpush1.msra.mxu1 %v338_v14  ;;  %v344_v7 = vand.u32 4294901760, %v343_v0  ;;  %178 = vmatprep.subr.mxu0 %v3641_v47  ;;  %v3706_v0 = vsub.f32 %v3552_v21, %v3583_v56  ;;  %v4852_v21 = vand.u32 4294901760, %v3687_v51 }
  0x52   :  { %v355_v54 = vsub.f32 %v3650_v61, %v4850_v38  ;;  %v350_v37 = vand.u32 4294901760, %v349_v48  ;;  %v361_v22 = vsub.f32 %v3661_v28, %v4851_v15  ;;  %180 = vmatpush1.msra.mxu0 %v3653_v39  ;;  %v367_v48 = vsub.f32 %v3675_v3, %v4763_v62 }
  0x53   :  { %345 = vmatprep.subr.mxu1 %v344_v7  ;;  %v3717_v15 = vsub.f32 %v3575_v9, %v3603_v1  ;;  %182 = vmatprep.subr.mxu0 %v3664_v27  ;;  %v4766_v7 = vand.u32 4294901760, %v3706_v0  ;;  %v3726_v62 = vsub.f32 %v3585_v49, %v3617_v20 }
  0x54   :  { %v356_v38 = vand.u32 4294901760, %v355_v54  ;;  %351 = vmatpush1.msra.mxu1 %v350_v37  ;;  %v362_v14 = vand.u32 4294901760, %v361_v22  ;;  %v373_v54 = vsub.f32 %v3687_v51, %v4852_v21  ;;  %v368_v56 = vand.u32 4294901760, %v367_v48  ;;  %184 = vmatpush1.msra.mxu0 %v3683_v29 }
  0x55   :  { %v4769_v9 = vand.u32 4294901760, %v3717_v15  ;;  %v3730_v37 = vand.u32 4294901760, %v91_v33  ;;  %v3734_v22 = vsub.f32 %v3596_v45, %v3628_v30  ;;  %186 = vmatprep.subr.mxu0 %v3697_v42  ;;  %v379_v49 = vsub.f32 %v3706_v0, %v4766_v7 }
  0x56   :  { %357 = vmatprep.subr.mxu1 %v356_v38  ;;  %v374_v21 = vand.u32 4294901760, %v373_v54  ;;  %v3743_v48 = vsub.f32 %v3609_v35, %v3641_v47  ;;  %188 = vmatpush1.msra.mxu0 %v3713_v31  ;;  %v3755_v7 = vsub.f32 %v3619_v34, %v3653_v39  ;;  %v4854_v35 = vand.u32 4294901760, %v3726_v62 }
  0x57   :  { %4853 = vst [vmem:[#allocation33_spill] sm:$0xff] %v3730_v37  ;;  %363 = vmatpush1.msra.mxu1 %v362_v14  ;;  %v385_v45 = vsub.f32 %v3717_v15, %v4769_v9  ;;  %v3750_v14 = vsub.f32 %v91_v33, %v3730_v37  ;;  %v380_v38 = vand.u32 4294901760, %v379_v49  ;;  %485 = vmatprep.subr.mxu0 %v3406_v19  ;;  %v4855_v34 = vand.u32 4294901760, %v3734_v22 }
  0x58   :  { %369 = vmatprep.subr.mxu1 %v368_v56  ;;  %v391_v56 = vsub.f32 %v3726_v62, %v4854_v35  ;;  %v4774_v47 = vand.u32 4294901760, %v3743_v48  ;;  %v3764_v33 = vsub.f32 %v3630_v55, %v3664_v27  ;;  %v4778_v49 = vand.u32 4294901760, %v3755_v7 }
  0x59   :  { %375 = vmatpush1.msra.mxu1 %v374_v21  ;;  %v386_v9 = vand.u32 4294901760, %v385_v45  ;;  %v4775_v54 = vand.u32 4294901760, %v3750_v14  ;;  %v397_v21 = vsub.f32 %v3734_v22, %v4855_v34  ;;  %v3777_v55 = vsub.f32 %v3655_v52, %v3683_v29 }
  0x5a   :  { %381 = vmatprep.subr.mxu1 %v380_v38  ;;  %v392_v39 = vand.u32 4294901760, %v391_v56  ;;  %v403_v35 = vsub.f32 %v3743_v48, %v4774_v47  ;;  %v4782_v30 = vand.u32 4294901760, %v3764_v33  ;;  %v409_v38 = vsub.f32 %v3755_v7, %v4778_v49 }
  0x5b   :  { %387 = vmatpush1.msra.mxu1 %v386_v9  ;;  %v225_v45 = vsub.f32 %v3750_v14, %v4775_v54  ;;  %v398_v34 = vand.u32 4294901760, %v397_v21  ;;  %v3787_v56 = vsub.f32 %v3666_v57, %v3697_v42  ;;  %v4781_v9 = vand.u32 4294901760, %v3777_v55 }
  0x5c   :  { %393 = vmatprep.subr.mxu1 %v392_v39  ;;  %v404_v47 = vand.u32 4294901760, %v403_v35  ;;  %v415_v52 = vsub.f32 %v3764_v33, %v4782_v30  ;;  %v3795_v54 = vsub.f32 %v3689_v40, %v3713_v31  ;;  %v410_v29 = vand.u32 4294901760, %v409_v38  ;;  %v4866_v30 = vld [vmem:[#allocation22_spill] sm:$0xff] }
  0x5d   :  { %4856 = vst [vmem:[#allocation34_spill] sm:$0xff] %v3787_v56  ;;  %v226_v21 = vand.u32 4294901760, %v225_v45  ;;  %399 = vmatpush1.msra.mxu1 %v398_v34  ;;  %v4780_v49 = vand.u32 4294901760, %v3787_v56  ;;  %v421_v39 = vsub.f32 %v3777_v55, %v4781_v9  ;;  %v4858_v38 = vmov 0.0  }
  0x5e   :  { %4857 = vst [vmem:[#allocation35_spill] sm:$0xff] %v3795_v54  ;;  %405 = vmatprep.subr.mxu1 %v404_v47  ;;  %v416_v57 = vand.u32 4294901760, %v415_v52  ;;  %v4779_v35 = vand.u32 4294901760, %v3795_v54  ;;  %v92_v52 = vld [vmem:[#allocation2 + $0x8] sm:$0xff] }
  0x5f   :  { %227 = vmatmul.mubr.f32.vlgmr.msra.gmra.mxu0 %v226_v21  ;;  %411 = vmatpush1.msra.mxu1 %v410_v29  ;;  %v427_v40 = vsub.f32 %v3787_v56, %v4780_v49  ;;  %v422_v45 = vand.u32 4294901760, %v421_v39  ;;  %v3820_v21 = vand.u32 4294901760, %v92_v52  ;;  %v4865_v49 = vld [vmem:[#allocation21_spill] sm:$0xff] }
  0x60   :  { %488 = vmatpush1.msra.mxu0 %v3419_v24  ;;  %417 = vmatprep.subr.mxu1 %v416_v57  ;;  %v433_v47 = vsub.f32 %v3795_v54, %v4779_v35  ;;  %v4864_v35 = vld [vmem:[#allocation20_spill] sm:$0xff] }
  0x61   :  { %491 = vmatprep.subr.mxu0 %v3425_v26  ;;  %v428_v34 = vand.u32 4294901760, %v427_v40  ;;  %232 = vmatprep.mubr.f32.mxu0 %v4858_v38  ;;  %v3831_v57 = vsub.f32 %v92_v52, %v3820_v21  ;;  %v4859_v40 = vld [vmem:[#allocation15_spill] sm:$0xff] }
  0x62   :  { %494 = vmatpush1.msra.mxu0 %v3439_v32  ;;  %423 = vmatpush1.msra.mxu1 %v422_v45  ;;  %v434_v29 = vand.u32 4294901760, %v433_v47  ;;  %v4860_v45 = vld [vmem:[#allocation16_spill] sm:$0xff]  ;;  %v4861_v47 = vld [vmem:[#allocation17_spill] sm:$0xff]  ;;  %v4863_v52 = vld [vmem:[#allocation19_spill] sm:$0xff] }
  0x63   :  { %497 = vmatprep.subr.mxu0 %v3448_v36  ;;  %429 = vmatprep.subr.mxu1 %v428_v34  ;;  %v4783_v39 = vand.u32 4294901760, %v3831_v57 }
  0x64   :  { %500 = vmatpush1.msra.mxu0 %v3461_v41  ;;  %435 = vmatpush1.msra.mxu1 %v434_v29  ;;  %v4862_v29 = vld [vmem:[#allocation18_spill] sm:$0xff] }
  0x65   :  { %503 = vmatprep.subr.mxu0 %v3475_v46  ;;  %470 = vmatmul.mubr.f32.vlgmr.msra.gmra.mxu1 %v3730_v37  ;;  %v236_v34 = vsub.f32 %v3831_v57, %v4783_v39  ;;  %v4867_v39 = vld [vmem:[#allocation23_spill] sm:$0xff]  ;;  %v4868_v37 = vld [vmem:[#allocation24_spill] sm:$0xff] }
  0x66   :  { %506 = vmatpush1.msra.mxu0 %v3501_v60  ;;  %629 = vmatprep.subr.mxu1 %v3386_v4 }
  0x67   :  { %509 = vmatprep.subr.mxu0 %v3513_v2  ;;  %631 = vmatpush1.msra.mxu1 %v3388_v5  ;;  %v237_v9 = vand.u32 4294901760, %v236_v34  ;;  %v4870_v34 = vld [vmem:[#allocation26_spill] sm:$0xff] }
  0x68   :  { %512 = vmatpush1.msra.mxu0 %v3524_v13  ;;  %633 = vmatprep.subr.mxu1 %v3390_v6 }
  0x69   :  { %515 = vmatprep.subr.mxu0 %v3535_v44  ;;  %635 = vmatpush1.msra.mxu1 %v3392_v10 }
  0x6a   :  { %518 = vmatpush1.msra.mxu0 %v3547_v53  ;;  %637 = vmatprep.subr.mxu1 %v3394_v11 }
  0x6b   :  { %521 = vmatprep.subr.mxu0 %v3561_v59  ;;  %639 = vmatpush1.msra.mxu1 %v3396_v12 }
  0x6c   :  { %524 = vmatpush1.msra.mxu0 %v3573_v43  ;;  %641 = vmatprep.subr.mxu1 %v3399_v16 }
  0x6d   :  { %527 = vmatprep.subr.mxu0 %v3594_v58  ;;  %643 = vmatpush1.msra.mxu1 %v3401_v17 }
  0x6e   :  { %530 = vmatpush1.msra.mxu0 %v3607_v8  ;;  %645 = vmatprep.subr.mxu1 %v3403_v18 }
  0x6f   :  { %533 = vmatprep.subr.mxu0 %v3625_v50  ;;  %647 = vmatpush1.msra.mxu1 %v3416_v23 }
  0x70   :  { %536 = vmatpush1.msra.mxu0 %v3638_v63  ;;  %649 = vmatprep.subr.mxu1 %v3422_v25 }
  0x71   :  { %539 = vmatprep.subr.mxu0 %v3650_v61  ;;  %651 = vmatpush1.msra.mxu1 %v4859_v40 }
  0x72   :  { %542 = vmatpush1.msra.mxu0 %v3661_v28  ;;  %653 = vmatprep.subr.mxu1 %v4860_v45 }
  0x73   :  { %545 = vmatprep.subr.mxu0 %v3675_v3  ;;  %655 = vmatpush1.msra.mxu1 %v4861_v47 }
  0x74   :  { %548 = vmatpush1.msra.mxu0 %v3687_v51  ;;  %657 = vmatprep.subr.mxu1 %v4862_v29 }
  0x75   :  { %551 = vmatprep.subr.mxu0 %v3706_v0  ;;  %659 = vmatpush1.msra.mxu1 %v4863_v52 }
  0x76   :  { %554 = vmatpush1.msra.mxu0 %v3717_v15  ;;  %661 = vmatprep.subr.mxu1 %v4864_v35  ;;  %v4869_v35 = vld [vmem:[#allocation25_spill] sm:$0xff] }
  0x77   :  { %557 = vmatprep.subr.mxu0 %v3726_v62  ;;  %663 = vmatpush1.msra.mxu1 %v4865_v49 }
  0x78   :  { %560 = vmatpush1.msra.mxu0 %v3734_v22  ;;  %665 = vmatprep.subr.mxu1 %v4866_v30 }
  0x79   :  { %563 = vmatprep.subr.mxu0 %v3743_v48  ;;  %667 = vmatpush1.msra.mxu1 %v4867_v39 }
  0x7a   :  { %566 = vmatpush1.msra.mxu0 %v3755_v7  ;;  %669 = vmatprep.subr.mxu1 %v4868_v37 }
  0x7b   :  { %238 = vmatmul.mubr.f32.gmra.mxu0 %v237_v9  ;;  %569 = vmatprep.subr.mxu0 %v3764_v33  ;;  %v4871_v9 = vand.u32 4294901760, %v3406_v19  ;;  %v4878_v19 = vand.u32 4294901760, %v3448_v36  ;;  %v4883_v36 = vand.u32 4294901760, %v3750_v14 }
  0x7c   :  { %572 = vmatpush1.msra.mxu0 %v3777_v55  ;;  %671 = vmatpush1.msra.mxu1 %v4869_v35  ;;  %v4876_v35 = vld [vmem:[#allocation31_spill] sm:$0xff] }
  0x7d   :  { %575 = vmatprep.subr.mxu0 %v3787_v56  ;;  %673 = vmatprep.subr.mxu1 %v4870_v34  ;;  %v4872_v56 = vld [vmem:[#allocation29_spill] sm:$0xff]  ;;  %v4873_v34 = vand.u32 4294901760, %v3419_v24  ;;  %v4879_v24 = vld [vmem:[#allocation32_spill] sm:$0xff] }
  0x7e   :  { %578 = vmatpush1.msra.mxu0 %v3795_v54  ;;  %611 = vmatprep.mubr.f32.mxu0 %v4858_v38  ;;  %v4874_v54 = vld [vmem:[#allocation30_spill] sm:$0xff] }
  0x7f   :  { %675 = vmatpush1.msra.mxu1 %v3603_v1  ;;  %475 = vmatprep.mubr.f32.mxu1 %v4858_v38  ;;  %v4875_v1 = vand.u32 4294901760, %v3425_v26  ;;  %v4881_v26 = vand.u32 4294901760, %v3475_v46  ;;  %v4886_v46 = vand.u32 4294901760, %v3535_v44  ;;  %v4904_v44 = vand.u32 4294901760, %v3743_v48 }
  0x80   :  { %614 = vmatmul.mubr.f32.vlgmr.msra.gmra.mxu0 %v3750_v14  ;;  %677 = vmatprep.subr.mxu1 %v3617_v20  ;;  %v4877_v20 = vand.u32 4294901760, %v3439_v32  ;;  %v4882_v32 = vand.u32 4294901760, %v3501_v60  ;;  %v4887_v60 = vand.u32 4294901760, %v3547_v53  ;;  %v4905_v53 = vand.u32 4294901760, %v3755_v7 }
  0x81   :  { %746 = vmatprep.subr.mxu0 %v4871_v9  ;;  %477 = vmatmul.mubr.f32.gmra.mxu1 %v3820_v21 }
  0x82   :  { %679 = vmatpush1.msra.mxu1 %v4872_v56  ;;  %750 = vmatpush1.msra.mxu0 %v4873_v34  ;;  %v4880_v34 = vand.u32 4294901760, %v3461_v41  ;;  %v4885_v41 = vand.u32 4294901760, %v3524_v13  ;;  %v4893_v13 = vand.u32 4294901760, %v3625_v50  ;;  %v4911_v50 = vld [vmem:[#allocation26_spill] sm:$0xff] }
  0x83   :  { %681 = vmatprep.subr.mxu1 %v4874_v54  ;;  %754 = vmatprep.subr.mxu0 %v4875_v1  ;;  %v4909_v1 = vld [vmem:[#allocation34_spill] sm:$0xff] }
  0x84   :  { %619 = vmatprep.mubr.f32.mxu0 %v4858_v38  ;;  %683 = vmatpush1.msra.mxu1 %v4876_v35 }
  0x85   :  { %758 = vmatpush1.msra.mxu0 %v4877_v20  ;;  %685 = vmatprep.subr.mxu1 %v3664_v27  ;;  %v4884_v20 = vand.u32 4294901760, %v3513_v2  ;;  %v4888_v2 = vand.u32 4294901760, %v3561_v59  ;;  %v4907_v59 = vand.u32 4294901760, %v3777_v55 }
  0x86   :  { %622 = vmatmul.mubr.f32.gmra.mxu0 %v3831_v57  ;;  %762 = vmatprep.subr.mxu0 %v4878_v19 }
  0x87   :  { %687 = vmatpush1.msra.mxu1 %v4879_v24  ;;  %766 = vmatpush1.msra.mxu0 %v4880_v34 }
  0x88   :  { %689 = vmatprep.subr.mxu1 %v3697_v42  ;;  %770 = vmatprep.subr.mxu0 %v4881_v26 }
  0x89   :  { %691 = vmatpush1.msra.mxu1 %v3713_v31  ;;  %724 = vmatprep.mubr.f32.mxu1 %v4858_v38 }
  0x8a   :  { %774 = vmatpush1.msra.mxu0 %v4882_v32  ;;  %728 = vmatmul.mubr.f32.vlgmr.msra.gmra.mxu1 %v4883_v36 }
  0x8b   :  { %778 = vmatprep.subr.mxu0 %v4884_v20  ;;  %919 = vmatprep.subr.mxu1 %v3386_v4  ;;  %v4889_v4 = vand.u32 4294901760, %v3831_v57  ;;  %v1058_v20 = vld [vmem:[#allocation7 + $0x48] sm:$0xff] }
  0x8c   :  { %782 = vmatpush1.msra.mxu0 %v4885_v41  ;;  %921 = vmatpush1.msra.mxu1 %v3388_v5  ;;  %v4890_v5 = vand.u32 4294901760, %v3573_v43  ;;  %v4903_v43 = vand.u32 4294901760, %v3734_v22 }
  0x8d   :  { %786 = vmatprep.subr.mxu0 %v4886_v46  ;;  %923 = vmatprep.subr.mxu1 %v3390_v6  ;;  %v4891_v6 = vand.u32 4294901760, %v3594_v58  ;;  %v4906_v58 = vand.u32 4294901760, %v3764_v33  ;;  %v1060_v33 = vld [vmem:[#allocation7 + $0x58] sm:$0xff] }
  0x8e   :  { %733 = vmatprep.mubr.f32.mxu1 %v4858_v38  ;;  %790 = vmatpush1.msra.mxu0 %v4887_v60  ;;  %v4068_v60 = vand.u32 4294901760, %v1058_v20 }
  0x8f   :  { %925 = vmatpush1.msra.mxu1 %v3392_v10  ;;  %794 = vmatprep.subr.mxu0 %v4888_v2  ;;  %v4892_v10 = vand.u32 4294901760, %v3607_v8  ;;  %v4908_v8 = vld [vmem:[#allocation25_spill] sm:$0xff] }
  0x90   :  { %737 = vmatmul.mubr.f32.gmra.mxu1 %v4889_v4  ;;  %927 = vmatprep.subr.mxu1 %v3394_v11  ;;  %v4894_v11 = vand.u32 4294901760, %v3638_v63  ;;  %v1057_v4 = vld [vmem:[#allocation7 + $0x40] sm:$0xff] }
  0x91   :  { %798 = vmatpush1.msra.mxu0 %v4890_v5  ;;  %929 = vmatpush1.msra.mxu1 %v3396_v12  ;;  %v4895_v12 = vand.u32 4294901760, %v3650_v61  ;;  %v4901_v61 = vand.u32 4294901760, %v3726_v62  ;;  %v4915_v62 = vld [vmem:[#allocation33_spill] sm:$0xff] }
  0x92   :  { %802 = vmatprep.subr.mxu0 %v4891_v6  ;;  %931 = vmatprep.subr.mxu1 %v3399_v16  ;;  %v4896_v16 = vand.u32 4294901760, %v3661_v28  ;;  %v4910_v28 = vand.u32 4294901760, %v4909_v1  ;;  %v4073_v6 = vsub.f32 %v1058_v20, %v4068_v60  ;;  %v1053_v1 = vld [vmem:[#allocation7 + $0x20] sm:$0xff] }
  0x93   :  { %806 = vmatpush1.msra.mxu0 %v4892_v10  ;;  %933 = vmatpush1.msra.mxu1 %v3401_v17  ;;  %v4897_v17 = vand.u32 4294901760, %v3675_v3  ;;  %v4902_v3 = vld [vmem:[#allocation20_spill] sm:$0xff]  ;;  %v4075_v10 = vand.u32 4294901760, %v1057_v4 }
  0x94   :  { %810 = vmatprep.subr.mxu0 %v4893_v13  ;;  %935 = vmatprep.subr.mxu1 %v3403_v18  ;;  %v4898_v18 = vand.u32 4294901760, %v3687_v51  ;;  %v4914_v51 = vld [vmem:[#allocation27_spill] sm:$0xff]  ;;  %v1056_v13 = vld [vmem:[#allocation7 + $0x38] sm:$0xff] }
  0x95   :  { %814 = vmatpush1.msra.mxu0 %v4894_v11  ;;  %937 = vmatpush1.msra.mxu1 %v3416_v23  ;;  %v4899_v23 = vand.u32 4294901760, %v3706_v0  ;;  %v4916_v0 = vld [vmem:[#allocation28_spill] sm:$0xff] }
  0x96   :  { %818 = vmatprep.subr.mxu0 %v4895_v12  ;;  %939 = vmatprep.subr.mxu1 %v3422_v25  ;;  %v4900_v25 = vand.u32 4294901760, %v3717_v15  ;;  %v1064_v15 = vld [vmem:[#allocation7 + $0x78] sm:$0xff]  ;;  %v4080_v12 = vand.u32 4294901760, %v4073_v6 }
  0x97   :  { %822 = vmatpush1.msra.mxu0 %v4896_v16  ;;  %941 = vmatpush1.msra.mxu1 %v4859_v40  ;;  %v3998_v7 = vand.u32 4294901760, %v1064_v15  ;;  %v4083_v16 = vsub.f32 %v1057_v4, %v4075_v10 }
  0x98   :  { %826 = vmatprep.subr.mxu0 %v4897_v17  ;;  %943 = vmatprep.subr.mxu1 %v4860_v45  ;;  %4918 = vst [vmem:[#allocation16_spill] sm:$0xff] %v4080_v12  ;;  %v4085_v17 = vand.u32 4294901760, %v1056_v13 }
  0x99   :  { %830 = vmatpush1.msra.mxu0 %v4898_v18  ;;  %945 = vmatpush1.msra.mxu1 %v4861_v47  ;;  %v4001_v22 = vsub.f32 %v1064_v15, %v3998_v7  ;;  %v1055_v18 = vld [vmem:[#allocation7 + $0x30] sm:$0xff] }
  0x9a   :  { %834 = vmatprep.subr.mxu0 %v4899_v23  ;;  %947 = vmatprep.subr.mxu1 %v4862_v29  ;;  %v1219_v23 = vsub.f32 %v4073_v6, %v4080_v12 }
  0x9b   :  { %838 = vmatpush1.msra.mxu0 %v4900_v25  ;;  %949 = vmatpush1.msra.mxu1 %v4863_v52  ;;  %v4092_v25 = vand.u32 4294901760, %v4083_v16 }
  0x9c   :  { %842 = vmatprep.subr.mxu0 %v4901_v61  ;;  %951 = vmatprep.subr.mxu1 %v4902_v3  ;;  %v4095_v61 = vsub.f32 %v1056_v13, %v4085_v17  ;;  %v4097_v3 = vand.u32 4294901760, %v1055_v18 }
  0x9d   :  { %846 = vmatpush1.msra.mxu0 %v4903_v43  ;;  %953 = vmatpush1.msra.mxu1 %v4865_v49  ;;  %v1059_v49 = vld [vmem:[#allocation7 + $0x50] sm:$0xff]  ;;  %4919 = vst [vmem:[#allocation17_spill] sm:$0xff] %v4092_v25  ;;  %v1054_v43 = vld [vmem:[#allocation7 + $0x28] sm:$0xff] }
  0x9e   :  { %850 = vmatprep.subr.mxu0 %v4904_v44  ;;  %955 = vmatprep.subr.mxu1 %v4866_v30  ;;  %v4912_v30 = vld [vmem:[#allocation35_spill] sm:$0xff]  ;;  %v1220_v44 = vand.u32 4294901760, %v1219_v23 }
  0x9f   :  { %854 = vmatpush1.msra.mxu0 %v4905_v53  ;;  %957 = vmatpush1.msra.mxu1 %v4867_v39  ;;  %v4913_v63 = vand.u32 4294901760, %v4912_v30  ;;  %v1226_v53 = vsub.f32 %v4083_v16, %v4092_v25 }
  0xa0   :  { %858 = vmatprep.subr.mxu0 %v4906_v58  ;;  %959 = vmatprep.subr.mxu1 %v4868_v37  ;;  %v1063_v37 = vld [vmem:[#allocation7 + $0x70] sm:$0xff]  ;;  %v4104_v58 = vand.u32 4294901760, %v4095_v61 }
  0xa1   :  { %862 = vmatpush1.msra.mxu0 %v4907_v59  ;;  %961 = vmatpush1.msra.mxu1 %v4908_v8  ;;  %v4107_v59 = vsub.f32 %v1055_v18, %v4097_v3  ;;  %v4110_v8 = vand.u32 4294901760, %v1054_v43 }
  0xa2   :  { %866 = vmatprep.subr.mxu0 %v4910_v28  ;;  %963 = vmatprep.subr.mxu1 %v4911_v50  ;;  %4920 = vst [vmem:[#allocation18_spill] sm:$0xff] %v4104_v58  ;;  %v1227_v28 = vand.u32 4294901760, %v1226_v53  ;;  %v1233_v50 = vsub.f32 %v4095_v61, %v4104_v58 }
  0xa3   :  { %870 = vmatpush1.msra.mxu0 %v4913_v63  ;;  %903 = vmatprep.mubr.f32.mxu0 %v4858_v38  ;;  %v4116_v30 = vand.u32 4294901760, %v4107_v59  ;;  %v4118_v63 = vand.u32 4294901760, %v1053_v1 }
  0xa4   :  { %965 = vmatpush1.msra.mxu1 %v4914_v51  ;;  %905 = vmatmul.mubr.f32.vlgmr.msra.gmra.mxu0 %v4915_v62  ;;  %v4121_v51 = vsub.f32 %v1054_v43, %v4110_v8 }
  0xa5   :  { %967 = vmatprep.subr.mxu1 %v4916_v0  ;;  %910 = vmatprep.mubr.f32.mxu0 %v4858_v38  ;;  %4921 = vst [vmem:[#allocation19_spill] sm:$0xff] %v4116_v30  ;;  %v1234_v0 = vand.u32 4294901760, %v1233_v50  ;;  %v1240_v15 = vsub.f32 %v4107_v59, %v4116_v30 }
  0xa6   :  { %969 = vmatpush1.msra.mxu1 %v4872_v56  ;;  %1014 = vmatprep.mubr.f32.mxu1 %v4858_v38  ;;  %v4018_v56 = vand.u32 4294901760, %v1060_v33 }
  0xa7   :  { %971 = vmatprep.subr.mxu1 %v4874_v54  ;;  %2756 = vmatprep.subr.mxu0 %v3998_v7  ;;  %v1061_v54 = vld [vmem:[#allocation7 + $0x60] sm:$0xff] }
  0xa8   :  { %973 = vmatpush1.msra.mxu1 %v4876_v35  ;;  %912 = vmatmul.mubr.f32.gmra.mxu0 %v3820_v21  ;;  %v4016_v55 = vand.u32 4294901760, %v1061_v54  ;;  %v4020_v35 = vand.u32 4294901760, %v1059_v49  ;;  %v4036_v40 = vsub.f32 %v1060_v33, %v4018_v56  ;;  %v1051_v33 = vld [vmem:[#allocation7 + $0x10] sm:$0xff] }
  0xa9   :  { %975 = vmatprep.subr.mxu1 %v3664_v27  ;;  %v4003_v27 = vand.u32 4294901760, %v1063_v37  ;;  %2757 = vmatpush3.msra.mxu0 %v3998_v7 }
  0xaa   :  { %977 = vmatpush1.msra.mxu1 %v4879_v24  ;;  %v4033_v39 = vsub.f32 %v1061_v54, %v4016_v55  ;;  %v4039_v45 = vsub.f32 %v1059_v49, %v4020_v35  ;;  %v4052_v19 = vand.u32 4294901760, %v4036_v40  ;;  %v4133_v54 = vand.u32 4294901760, %v4121_v51 }
  0xab   :  { %979 = vmatprep.subr.mxu1 %v3697_v42  ;;  %v1062_v42 = vld [vmem:[#allocation7 + $0x68] sm:$0xff]  ;;  %v4011_v48 = vsub.f32 %v1063_v37, %v4003_v27  ;;  %2758 = vmatprep.subr.mxu0 %v4003_v27  ;;  %v4127_v37 = vsub.f32 %v1053_v1, %v4118_v63  ;;  %v1241_v49 = vand.u32 4294901760, %v1240_v15 }
  0xac   :  { %981 = vmatpush1.msra.mxu1 %v3713_v31  ;;  %v4008_v31 = vand.u32 4294901760, %v4001_v22  ;;  %v4013_v14 = vand.u32 4294901760, %v1062_v42  ;;  %2759 = vmatpush3.msra.mxu0 %v4003_v27  ;;  %v4049_v9 = vand.u32 4294901760, %v4033_v39  ;;  %v4055_v24 = vand.u32 4294901760, %v4039_v45  ;;  %4922 = vst [vmem:[#allocation21_spill] sm:$0xff] %v4133_v54 }
  0xad   :  { %1016 = vmatmul.mubr.f32.vlgmr.msra.gmra.mxu1 %v4915_v62  ;;  %v1205_v36 = vsub.f32 %v4036_v40, %v4052_v19  ;;  %v1052_v62 = vld [vmem:[#allocation7 + $0x18] sm:$0xff] }
  0xae   :  { %1021 = vmatprep.mubr.f32.mxu1 %v4858_v38  ;;  %v1177_v38 = vsub.f32 %v4001_v22, %v4008_v31  ;;  %v4029_v57 = vsub.f32 %v1062_v42, %v4013_v14  ;;  %2760 = vmatprep.subr.mxu0 %v4013_v14  ;;  %4917 = vst [vmem:[#allocation15_spill] sm:$0xff] %v4055_v24  ;;  %v4129_v42 = vand.u32 4294901760, %v1052_v62 }
  0xaf   :  { %2761 = vmatpush3.msra.mxu0 %v4013_v14  ;;  %v1198_v32 = vsub.f32 %v4033_v39, %v4049_v9  ;;  %v1212_v46 = vsub.f32 %v4039_v45, %v4055_v24  ;;  %v1206_v5 = vand.u32 4294901760, %v1205_v36 }
  0xb0   :  { %v1178_v47 = vand.u32 4294901760, %v1177_v38  ;;  %v4045_v52 = vand.u32 4294901760, %v4029_v57  ;;  %2762 = vmatprep.subr.mxu0 %v4016_v55  ;;  %v4137_v38 = vand.u32 4294901760, %v4127_v37 }
  0xb1   :  { %1023 = vmatmul.mubr.f32.gmra.mxu1 %v3820_v21  ;;  %v4026_v21 = vand.u32 4294901760, %v4011_v48  ;;  %2763 = vmatpush3.msra.mxu0 %v4016_v55  ;;  %v1199_v2 = vand.u32 4294901760, %v1198_v32  ;;  %v1213_v11 = vand.u32 4294901760, %v1212_v46 }
  0xb2   :  { %2791 = vmatprep.subr.mxu1 %v1178_v47  ;;  %v1191_v26 = vsub.f32 %v4029_v57, %v4045_v52  ;;  %2764 = vmatprep.subr.mxu0 %v4018_v56  ;;  %4923 = vst [vmem:[#allocation22_spill] sm:$0xff] %v4137_v38  ;;  %v1254_v32 = vsub.f32 %v4127_v37, %v4137_v38 }
  0xb3   :  { %v1184_v29 = vsub.f32 %v4011_v48, %v4026_v21  ;;  %2792 = vmatpush3.msra.mxu1 %v1178_v47  ;;  %2765 = vmatpush3.msra.mxu0 %v4018_v56  ;;  %v4140_v47 = vsub.f32 %v1052_v62, %v4129_v42 }
  0xb4   :  { %v1192_v41 = vand.u32 4294901760, %v1191_v26  ;;  %2766 = vmatprep.subr.mxu0 %v4020_v35  ;;  %v1050_v26 = vld [vmem:[#allocation7 + $0x8] sm:$0xff]  ;;  %v1255_v4 = vand.u32 4294901760, %v1254_v32 }
  0xb5   :  { %v1185_v34 = vand.u32 4294901760, %v1184_v29  ;;  %2767 = vmatpush3.msra.mxu0 %v4020_v35  ;;  %v4142_v29 = vand.u32 4294901760, %v1051_v33  ;;  %v4151_v36 = vand.u32 4294901760, %v4140_v47 }
  0xb6   :  { %2768 = vmatprep.subr.mxu0 %v4068_v60 }
  0xb7   :  { %2793 = vmatprep.subr.mxu1 %v1185_v34  ;;  %2769 = vmatpush3.msra.mxu0 %v4068_v60  ;;  %4924 = vst [vmem:[#allocation23_spill] sm:$0xff] %v4151_v36  ;;  %v4154_v20 = vsub.f32 %v1051_v33, %v4142_v29 }
  0xb8   :  { %2794 = vmatpush3.msra.mxu1 %v1185_v34  ;;  %2770 = vmatprep.subr.mxu0 %v4075_v10  ;;  %v1247_v34 = vsub.f32 %v4121_v51, %v4133_v54 }
  0xb9   :  { %2795 = vmatprep.subr.mxu1 %v1192_v41  ;;  %2771 = vmatpush3.msra.mxu0 %v4075_v10  ;;  %v4163_v13 = vand.u32 4294901760, %v4154_v20 }
  0xba   :  { %2796 = vmatpush3.msra.mxu1 %v1192_v41  ;;  %2772 = vmatprep.subr.mxu0 %v4085_v17  ;;  %v4156_v41 = vand.u32 4294901760, %v1050_v26  ;;  %v1248_v46 = vand.u32 4294901760, %v1247_v34 }
  0xbb   :  { %2797 = vmatprep.subr.mxu1 %v1199_v2  ;;  %2773 = vmatpush3.msra.mxu0 %v4085_v17  ;;  %4925 = vst [vmem:[#allocation24_spill] sm:$0xff] %v4163_v13  ;;  %v1268_v43 = vsub.f32 %v4154_v20, %v4163_v13 }
  0xbc   :  { %2798 = vmatpush3.msra.mxu1 %v1199_v2  ;;  %2774 = vmatprep.subr.mxu0 %v4097_v3  ;;  %v1049_v2 = vld [vmem:[#allocation7] sm:$0xff] }
  0xbd   :  { %2799 = vmatprep.subr.mxu1 %v1206_v5  ;;  %2775 = vmatpush3.msra.mxu0 %v4097_v3  ;;  %v4169_v18 = vand.u32 4294901760, %v1049_v2  ;;  %v1269_v1 = vand.u32 4294901760, %v1268_v43 }
  0xbe   :  { %2800 = vmatpush3.msra.mxu1 %v1206_v5  ;;  %2776 = vmatprep.subr.mxu0 %v4110_v8  ;;  %v1261_v5 = vsub.f32 %v4140_v47, %v4151_v36 }
  0xbf   :  { %2801 = vmatprep.subr.mxu1 %v1213_v11  ;;  %2777 = vmatpush3.msra.mxu0 %v4110_v8  ;;  %v4179_v53 = vsub.f32 %v1049_v2, %v4169_v18 }
  0xc0   :  { %2802 = vmatpush3.msra.mxu1 %v1213_v11  ;;  %2778 = vmatprep.subr.mxu0 %v4118_v63  ;;  %v4166_v11 = vsub.f32 %v1050_v26, %v4156_v41  ;;  %v1262_v23 = vand.u32 4294901760, %v1261_v5 }
  0xc1   :  { %2803 = vmatprep.subr.mxu1 %v1220_v44  ;;  %2779 = vmatpush3.msra.mxu0 %v4118_v63  ;;  %v4186_v50 = vand.u32 4294901760, %v4179_v53 }
  0xc2   :  { %2804 = vmatpush3.msra.mxu1 %v1220_v44  ;;  %2780 = vmatprep.subr.mxu0 %v4129_v42  ;;  %v4175_v44 = vand.u32 4294901760, %v4166_v11 }
  0xc3   :  { %2805 = vmatprep.subr.mxu1 %v1227_v28  ;;  %2781 = vmatpush3.msra.mxu0 %v4129_v42  ;;  %4927 = vst [vmem:[#allocation30_spill] sm:$0xff] %v4186_v50 }
  0xc4   :  { %2806 = vmatpush3.msra.mxu1 %v1227_v28  ;;  %2782 = vmatprep.subr.mxu0 %v4142_v29  ;;  %4926 = vst [vmem:[#allocation29_spill] sm:$0xff] %v4175_v44  ;;  %v1275_v28 = vsub.f32 %v4166_v11, %v4175_v44 }
  0xc5   :  { %2807 = vmatprep.subr.mxu1 %v1234_v0  ;;  %2783 = vmatpush3.msra.mxu0 %v4142_v29 }
  0xc6   :  { %2808 = vmatpush3.msra.mxu1 %v1234_v0  ;;  %2784 = vmatprep.subr.mxu0 %v4156_v41  ;;  %v1276_v62 = vand.u32 4294901760, %v1275_v28  ;;  %v1282_v0 = vsub.f32 %v4179_v53, %v4186_v50 }
  0xc7   :  { %2809 = vmatprep.subr.mxu1 %v1241_v49  ;;  %2785 = vmatpush3.msra.mxu0 %v4156_v41 }
  0xc8   :  { %2810 = vmatpush3.msra.mxu1 %v1241_v49  ;;  %2786 = vmatprep.subr.mxu0 %v4169_v18  ;;  %v1283_v15 = vand.u32 4294901760, %v1282_v0 }
  0xc9   :  { %2811 = vmatprep.subr.mxu1 %v1248_v46  ;;  %2787 = vmatpush3.msra.mxu0 %v4169_v18 }
  0xca   :  { %2812 = vmatpush3.msra.mxu1 %v1248_v46  ;;  %2826 = vmatprep.subr.mxu0 %v4001_v22 }
  0xcb   :  { %2813 = vmatprep.subr.mxu1 %v1255_v4 }
  0xcc   :  { %2814 = vmatpush3.msra.mxu1 %v1255_v4 }
  0xcd   :  { %2815 = vmatprep.subr.mxu1 %v1262_v23 }
  0xce   :  { %2816 = vmatpush3.msra.mxu1 %v1262_v23 }
  0xcf   :  { %2817 = vmatprep.subr.mxu1 %v1269_v1 }
  0xd0   :  { %2818 = vmatpush3.msra.mxu1 %v1269_v1 }
  0xd1   :  { %2819 = vmatprep.subr.mxu1 %v1276_v62 }
  0xd2   :  { %2820 = vmatpush3.msra.mxu1 %v1276_v62 }
  0xd3   :  { %2821 = vmatprep.subr.mxu1 %v1283_v15 }
  0xd4   :  { %2822 = vmatpush3.msra.mxu1 %v1283_v15 }
  0xd5   :  { %2861 = vmatprep.subr.mxu1 %v3998_v7 }
 0x11f   :  { %v228_v33 = vpop.f32.mrf.mxu0 }
 0x121   :  { %v230_v34 = vpop.f32.mrf.mxu0 }
 0x125   :  { %v471_v49 = vpop.f32.mrf.mxu1 }
 0x127   :  { %v473_v26 = vpop.f32.mrf.mxu1 }
 0x128   :  { %v474_v32 = vadd.f32 %v473_v26, %v230_v34  ;;  %v472_v34 = vadd.f32 %v471_v49, %v228_v33 }
 0x13b   :  { %v239_v46 = vpop.f32.mrf.mxu0 }
 0x13d   :  { %v241_v2 = vpop.f32.mrf.mxu0 }
 0x140   :  { %v615_v4 = vpop.f32.mrf.mxu0 }
 0x141   :  { %v478_v5 = vpop.f32.mrf.mxu1  ;;  %v616_v25 = vadd.f32 %v615_v4, %v472_v34 }
 0x142   :  { %v617_v23 = vpop.f32.mrf.mxu0  ;;  %v479_v12 = vadd.f32 %v478_v5, %v239_v46 }
 0x143   :  { %v618_v43 = vadd.f32 %v617_v23, %v474_v32  ;;  %v480_v28 = vpop.f32.mrf.mxu1 }
 0x144   :  { %v481_v1 = vadd.f32 %v480_v28, %v241_v2 }
 0x146   :  { %v623_v50 = vpop.f32.mrf.mxu0 }
 0x147   :  { %v624_v32 = vadd.f32 %v623_v50, %v479_v12 }
 0x148   :  { %v625_v0 = vpop.f32.mrf.mxu0 }
 0x149   :  { %v626_v62 = vadd.f32 %v625_v0, %v481_v1  ;;  %v2534_v1 = vld [vmem:[%s4714_s2] ss:$0 sm:$0xff] }
 0x14a   :  { %v729_v44 = vpop.f32.mrf.mxu1 }
 0x14b   :  { %v730_v24 = vadd.f32 %v729_v44, %v616_v25 }
 0x14c   :  { %v731_v15 = vpop.f32.mrf.mxu1 }
 0x14d   :  { %v732_v13 = vadd.f32 %v731_v15, %v618_v43 }
 0x150   :  { %v738_v36 = vpop.f32.mrf.mxu1 }
 0x151   :  { %v739_v43 = vadd.f32 %v738_v36, %v624_v32 }
 0x152   :  { %v740_v38 = vpop.f32.mrf.mxu1 }
 0x153   :  { %v4192_v54 = vadd.f32 %v740_v38, %v626_v62 }
 0x155   :  { %4928 = vst [vmem:[#allocation31_spill] sm:$0xff] %v4192_v54 }
 0x164   :  { %v906_v30 = vpop.f32.mrf.mxu0 }
 0x165   :  { %v907_v23 = vadd.f32 %v906_v30, %v730_v24 }
 0x166   :  { %v908_v26 = vpop.f32.mrf.mxu0 }
 0x167   :  { %v909_v58 = vadd.f32 %v908_v26, %v732_v13 }
 0x168   :  { %v913_v2 = vpop.f32.mrf.mxu0 }
 0x169   :  { %v914_v38 = vadd.f32 %v913_v2, %v739_v43 }
 0x16d   :  { %v1017_v28 = vpop.f32.mrf.mxu1 }
 0x16e   :  { %v1018_v0 = vadd.f32 %v1017_v28, %v907_v23 }
 0x16f   :  { %v1019_v15 = vpop.f32.mrf.mxu1 }
 0x170   :  { %v1036_v62 = vadd.f32 %v2534_v1, %v1018_v0  ;;  %v4197_v54 = vadd.f32 %v1019_v15, %v909_v58 }
 0x171   :  { %v1024_v33 = vpop.f32.mrf.mxu1 }
 0x172   :  { %4929 = vst [vmem:[#allocation32_spill] sm:$0xff] %v4197_v54  ;;  %v1038_v13 = vmax.f32 %v1036_v62, 0.0  ;;  %v1025_v49 = vadd.f32 %v1024_v33, %v914_v38 }
 0x174   :  { %v4199_v46 = vand.u32 4294901760, %v1038_v13  ;;  %v1037_v12 = vadd.f32 %v2534_v1, %v1025_v49 }
 0x176   :  { %v1154_v24 = vsub.f32 %v1038_v13, %v4199_v46  ;;  %v1039_v25 = vmax.f32 %v1037_v12, 0.0  ;;  %2823 = vmatprep.mubr.f32.mxu1 %v4199_v46  ;;  %v1766_v13 = vld [vmem:[#allocation8 + $0x40] sm:$0xff] }
 0x177   :  { %v4424_v12 = vand.u32 4294901760, %v1766_v13 }
 0x178   :  { %v4203_v30 = vand.u32 4294901760, %v1039_v25  ;;  %v1155_v36 = vand.u32 4294901760, %v1154_v24 }
 0x17a   :  { %v4206_v44 = vsub.f32 %v1039_v25, %v4203_v30  ;;  %2824 = vmatmul.mubr.f32.vlgmr.msra.gmra.mxu1 %v4203_v30  ;;  %v1156_v58 = vsub.f32 %v1154_v24, %v1155_v36 }
 0x17b   :  { %2862 = vmatpush3.msra.mxu1 %v3998_v7  ;;  %2893 = vmatprep.mubr.f32.mxu1 %v1155_v36 }
 0x17c   :  { %v1165_v50 = vand.u32 4294901760, %v4206_v44  ;;  %2863 = vmatprep.subr.mxu1 %v4003_v27  ;;  %v1157_v4 = vand.u32 4294901760, %v1156_v58 }
 0x17d   :  { %2864 = vmatpush3.msra.mxu1 %v4003_v27 }
 0x17e   :  { %v1166_v5 = vsub.f32 %v4206_v44, %v1165_v50  ;;  %2865 = vmatprep.subr.mxu1 %v4013_v14  ;;  %2788 = vmatprep.mubr.f32.mxu0 %v1157_v4 }
 0x17f   :  { %2866 = vmatpush3.msra.mxu1 %v4013_v14 }
 0x180   :  { %v1167_v34 = vand.u32 4294901760, %v1166_v5  ;;  %2867 = vmatprep.subr.mxu1 %v4016_v55 }
 0x181   :  { %2868 = vmatpush3.msra.mxu1 %v4016_v55 }
 0x182   :  { %2869 = vmatprep.subr.mxu1 %v4018_v56  ;;  %2789 = vmatmul.mubr.f32.vlgmr.msra.gmra.mxu0 %v1167_v34  ;;  %v1763_v34 = vld [vmem:[#allocation8 + $0x28] sm:$0xff] }
 0x183   :  { %2827 = vmatpush3.msra.mxu0 %v4001_v22  ;;  %2870 = vmatpush3.msra.mxu1 %v4018_v56  ;;  %v4931_v22 = vld [vmem:[#allocation16_spill] sm:$0xff] }
 0x184   :  { %2828 = vmatprep.subr.mxu0 %v4011_v48  ;;  %2858 = vmatprep.mubr.f32.mxu0 %v1154_v24  ;;  %v1765_v24 = vld [vmem:[#allocation8 + $0x38] sm:$0xff] }
 0x185   :  { %2871 = vmatprep.subr.mxu1 %v4020_v35  ;;  %2829 = vmatpush3.msra.mxu0 %v4011_v48  ;;  %v4934_v48 = vld [vmem:[#allocation19_spill] sm:$0xff]  ;;  %v4431_v36 = vand.u32 4294901760, %v1765_v24 }
 0x186   :  { %2872 = vmatpush3.msra.mxu1 %v4020_v35  ;;  %2830 = vmatprep.subr.mxu0 %v4029_v57 }
 0x187   :  { %2873 = vmatprep.subr.mxu1 %v4068_v60  ;;  %2831 = vmatpush3.msra.mxu0 %v4029_v57  ;;  %v4940_v57 = vld [vmem:[#allocation30_spill] sm:$0xff]  ;;  %v4439_v4 = vsub.f32 %v1765_v24, %v4431_v36 }
 0x188   :  { %2874 = vmatpush3.msra.mxu1 %v4068_v60  ;;  %2832 = vmatprep.subr.mxu0 %v4033_v39 }
 0x189   :  { %2875 = vmatprep.subr.mxu1 %v4075_v10  ;;  %2833 = vmatpush3.msra.mxu0 %v4033_v39  ;;  %v1773_v39 = vld [vmem:[#allocation8 + $0x78] sm:$0xff] }
 0x18a   :  { %2876 = vmatpush3.msra.mxu1 %v4075_v10  ;;  %2834 = vmatprep.subr.mxu0 %v4036_v40 }
 0x18b   :  { %2877 = vmatprep.subr.mxu1 %v4085_v17  ;;  %2835 = vmatpush3.msra.mxu0 %v4036_v40  ;;  %v4342_v40 = vand.u32 4294901760, %v1773_v39 }
 0x18c   :  { %2878 = vmatpush3.msra.mxu1 %v4085_v17  ;;  %2836 = vmatprep.subr.mxu0 %v4039_v45 }
 0x18d   :  { %2879 = vmatprep.subr.mxu1 %v4097_v3  ;;  %2837 = vmatpush3.msra.mxu0 %v4039_v45  ;;  %v1772_v45 = vld [vmem:[#allocation8 + $0x70] sm:$0xff] }
 0x18e   :  { %2880 = vmatpush3.msra.mxu1 %v4097_v3  ;;  %2838 = vmatprep.subr.mxu0 %v4073_v6 }
 0x18f   :  { %2881 = vmatprep.subr.mxu1 %v4110_v8  ;;  %2839 = vmatpush3.msra.mxu0 %v4073_v6 }
 0x190   :  { %2882 = vmatpush3.msra.mxu1 %v4110_v8  ;;  %2840 = vmatprep.subr.mxu0 %v4083_v16 }
 0x191   :  { %2883 = vmatprep.subr.mxu1 %v4118_v63  ;;  %2841 = vmatpush3.msra.mxu0 %v4083_v16  ;;  %v1768_v16 = vld [vmem:[#allocation8 + $0x50] sm:$0xff] }
 0x192   :  { %2884 = vmatpush3.msra.mxu1 %v4118_v63  ;;  %2842 = vmatprep.subr.mxu0 %v4095_v61 }
 0x193   :  { %2885 = vmatprep.subr.mxu1 %v4129_v42  ;;  %2843 = vmatpush3.msra.mxu0 %v4095_v61  ;;  %v4351_v61 = vsub.f32 %v1773_v39, %v4342_v40 }
 0x194   :  { %2886 = vmatpush3.msra.mxu1 %v4129_v42  ;;  %2844 = vmatprep.subr.mxu0 %v4107_v59 }
 0x195   :  { %2887 = vmatprep.subr.mxu1 %v4142_v29  ;;  %2845 = vmatpush3.msra.mxu0 %v4107_v59  ;;  %v4356_v59 = vand.u32 4294901760, %v1768_v16 }
 0x196   :  { %2888 = vmatpush3.msra.mxu1 %v4142_v29  ;;  %2846 = vmatprep.subr.mxu0 %v4121_v51 }
 0x197   :  { %2889 = vmatprep.subr.mxu1 %v4156_v41  ;;  %2847 = vmatpush3.msra.mxu0 %v4121_v51 }
 0x198   :  { %2890 = vmatpush3.msra.mxu1 %v4156_v41  ;;  %2848 = vmatprep.subr.mxu0 %v4127_v37 }
 0x199   :  { %2891 = vmatprep.subr.mxu1 %v4169_v18  ;;  %2849 = vmatpush3.msra.mxu0 %v4127_v37 }
 0x19a   :  { %2892 = vmatpush3.msra.mxu1 %v4169_v18  ;;  %2850 = vmatprep.subr.mxu0 %v4140_v47 }
 0x19b   :  { %2894 = vmatmul.mubr.f32.vlgmr.msra.gmra.mxu1 %v1165_v50  ;;  %2931 = vmatprep.subr.mxu1 %v3998_v7 }
 0x19c   :  { %2851 = vmatpush3.msra.mxu0 %v4140_v47  ;;  %2932 = vmatpush3.msra.mxu1 %v3998_v7  ;;  %v4930_v7 = vld [vmem:[#allocation15_spill] sm:$0xff] }
 0x19d   :  { %2963 = vmatprep.mubr.f32.mxu1 %v4199_v46  ;;  %2852 = vmatprep.subr.mxu0 %v4154_v20 }
 0x19e   :  { %2933 = vmatprep.subr.mxu1 %v4003_v27  ;;  %2853 = vmatpush3.msra.mxu0 %v4154_v20 }
 0x19f   :  { %2934 = vmatpush3.msra.mxu1 %v4003_v27  ;;  %2854 = vmatprep.subr.mxu0 %v4166_v11  ;;  %v4932_v27 = vld [vmem:[#allocation17_spill] sm:$0xff] }
 0x1a0   :  { %2935 = vmatprep.subr.mxu1 %v4013_v14  ;;  %2855 = vmatpush3.msra.mxu0 %v4166_v11 }
 0x1a1   :  { %2936 = vmatpush3.msra.mxu1 %v4013_v14  ;;  %2856 = vmatprep.subr.mxu0 %v4179_v53  ;;  %v4935_v14 = vld [vmem:[#allocation21_spill] sm:$0xff] }
 0x1a2   :  { %2937 = vmatprep.subr.mxu1 %v4016_v55  ;;  %2857 = vmatpush3.msra.mxu0 %v4179_v53 }
 0x1a3   :  { %2938 = vmatpush3.msra.mxu1 %v4016_v55  ;;  %2859 = vmatmul.mubr.f32.vlgmr.msra.gmra.mxu0 %v4206_v44  ;;  %v4936_v55 = vld [vmem:[#allocation22_spill] sm:$0xff]  ;;  %v1764_v44 = vld [vmem:[#allocation8 + $0x30] sm:$0xff] }
 0x1a4   :  { %2896 = vmatprep.subr.mxu0 %v4008_v31  ;;  %2939 = vmatprep.subr.mxu1 %v4018_v56  ;;  %v4441_v5 = vand.u32 4294901760, %v1764_v44 }
 0x1a5   :  { %2897 = vmatpush3.msra.mxu0 %v4008_v31  ;;  %2928 = vmatprep.mubr.f32.mxu0 %v4199_v46  ;;  %v4933_v31 = vld [vmem:[#allocation18_spill] sm:$0xff] }
 0x1a6   :  { %2940 = vmatpush3.msra.mxu1 %v4018_v56  ;;  %2898 = vmatprep.subr.mxu0 %v4026_v21  ;;  %v4937_v56 = vld [vmem:[#allocation23_spill] sm:$0xff] }
 0x1a7   :  { %2941 = vmatprep.subr.mxu1 %v4020_v35  ;;  %2899 = vmatpush3.msra.mxu0 %v4026_v21  ;;  %v4939_v21 = vld [vmem:[#allocation29_spill] sm:$0xff] }
 0x1a8   :  { %2942 = vmatpush3.msra.mxu1 %v4020_v35  ;;  %2900 = vmatprep.subr.mxu0 %v4045_v52  ;;  %v4938_v35 = vld [vmem:[#allocation24_spill] sm:$0xff] }
 0x1a9   :  { %2943 = vmatprep.subr.mxu1 %v4068_v60  ;;  %2901 = vmatpush3.msra.mxu0 %v4045_v52  ;;  %v1771_v52 = vld [vmem:[#allocation8 + $0x68] sm:$0xff] }
 0x1aa   :  { %2944 = vmatpush3.msra.mxu1 %v4068_v60  ;;  %2902 = vmatprep.subr.mxu0 %v4049_v9  ;;  %v4346_v60 = vand.u32 4294901760, %v1771_v52 }
 0x1ab   :  { %2945 = vmatprep.subr.mxu1 %v4075_v10  ;;  %2903 = vmatpush3.msra.mxu0 %v4049_v9  ;;  %v1770_v9 = vld [vmem:[#allocation8 + $0x60] sm:$0xff] }
 0x1ac   :  { %2946 = vmatpush3.msra.mxu1 %v4075_v10  ;;  %2904 = vmatprep.subr.mxu0 %v4052_v19  ;;  %v4348_v6 = vand.u32 4294901760, %v1770_v9  ;;  %v1769_v10 = vld [vmem:[#allocation8 + $0x58] sm:$0xff]  ;;  %v4364_v51 = vsub.f32 %v1771_v52, %v4346_v60 }
 0x1ad   :  { %2947 = vmatprep.subr.mxu1 %v4085_v17  ;;  %2905 = vmatpush3.msra.mxu0 %v4052_v19  ;;  %v4344_v19 = vand.u32 4294901760, %v1772_v45 }
 0x1ae   :  { %2948 = vmatpush3.msra.mxu1 %v4085_v17  ;;  %2906 = vmatprep.subr.mxu0 %v4930_v7  ;;  %v1767_v17 = vld [vmem:[#allocation8 + $0x48] sm:$0xff]  ;;  %v4367_v37 = vsub.f32 %v1770_v9, %v4348_v6 }
 0x1af   :  { %2949 = vmatprep.subr.mxu1 %v4097_v3  ;;  %2907 = vmatpush3.msra.mxu0 %v4930_v7 }
 0x1b0   :  { %2950 = vmatpush3.msra.mxu1 %v4097_v3  ;;  %2908 = vmatprep.subr.mxu0 %v4931_v22  ;;  %v4354_v3 = vand.u32 4294901760, %v1769_v10  ;;  %v4387_v11 = vand.u32 4294901760, %v4367_v37 }
 0x1b1   :  { %2951 = vmatprep.subr.mxu1 %v4110_v8  ;;  %2909 = vmatpush3.msra.mxu0 %v4931_v22  ;;  %v4448_v22 = vand.u32 4294901760, %v4439_v4 }
 0x1b2   :  { %2952 = vmatpush3.msra.mxu1 %v4110_v8  ;;  %2910 = vmatprep.subr.mxu0 %v4932_v27  ;;  %v4358_v8 = vand.u32 4294901760, %v1767_v17  ;;  %v4374_v47 = vsub.f32 %v1769_v10, %v4354_v3  ;;  %v1907_v28 = vsub.f32 %v4367_v37, %v4387_v11 }
 0x1b3   :  { %2953 = vmatprep.subr.mxu1 %v4118_v63  ;;  %2911 = vmatpush3.msra.mxu0 %v4932_v27  ;;  %4942 = vst [vmem:[#allocation25_spill] sm:$0xff] %v4448_v22  ;;  %v4451_v27 = vsub.f32 %v1764_v44, %v4441_v5 }
 0x1b4   :  { %2954 = vmatpush3.msra.mxu1 %v4118_v63  ;;  %2912 = vmatprep.subr.mxu0 %v4933_v31  ;;  %v4361_v63 = vsub.f32 %v1772_v45, %v4344_v19  ;;  %v4393_v53 = vand.u32 4294901760, %v4374_v47  ;;  %v4397_v26 = vsub.f32 %v1767_v17, %v4358_v8  ;;  %v1908_v62 = vand.u32 4294901760, %v1907_v28  ;;  %v1759_v28 = vld [vmem:[#allocation8 + $0x8] sm:$0xff] }
 0x1b5   :  { %2955 = vmatprep.subr.mxu1 %v4129_v42  ;;  %2913 = vmatpush3.msra.mxu0 %v4933_v31  ;;  %v4453_v31 = vand.u32 4294901760, %v1763_v34 }
 0x1b6   :  { %2956 = vmatpush3.msra.mxu1 %v4129_v42  ;;  %2914 = vmatprep.subr.mxu0 %v4934_v48  ;;  %v4371_v42 = vand.u32 4294901760, %v4351_v61  ;;  %v4381_v20 = vand.u32 4294901760, %v4361_v63  ;;  %v1914_v15 = vsub.f32 %v4374_v47, %v4393_v53  ;;  %v4414_v38 = vand.u32 4294901760, %v4397_v26 }
 0x1b7   :  { %2957 = vmatprep.subr.mxu1 %v4142_v29  ;;  %2915 = vmatpush3.msra.mxu0 %v4934_v48  ;;  %v1762_v48 = vld [vmem:[#allocation8 + $0x20] sm:$0xff] }
 0x1b8   :  { %2958 = vmatpush3.msra.mxu1 %v4142_v29  ;;  %2916 = vmatprep.subr.mxu0 %v4935_v14  ;;  %v4378_v29 = vsub.f32 %v1768_v16, %v4356_v59  ;;  %v1893_v32 = vsub.f32 %v4361_v63, %v4381_v20  ;;  %v1915_v49 = vand.u32 4294901760, %v1914_v15  ;;  %v1928_v46 = vsub.f32 %v4397_v26, %v4414_v38  ;;  %v1760_v16 = vld [vmem:[#allocation8 + $0x10] sm:$0xff] }
 0x1b9   :  { %2959 = vmatprep.subr.mxu1 %v4156_v41  ;;  %2917 = vmatpush3.msra.mxu0 %v4935_v14 }
 0x1ba   :  { %2960 = vmatpush3.msra.mxu1 %v4156_v41  ;;  %2918 = vmatprep.subr.mxu0 %v4936_v55  ;;  %v4384_v41 = vand.u32 4294901760, %v4364_v51  ;;  %v4407_v1 = vand.u32 4294901760, %v4378_v29  ;;  %v1894_v43 = vand.u32 4294901760, %v1893_v32  ;;  %v1929_v58 = vand.u32 4294901760, %v1928_v46 }
 0x1bb   :  { %2961 = vmatprep.subr.mxu1 %v4169_v18  ;;  %2919 = vmatpush3.msra.mxu0 %v4936_v55  ;;  %v1942_v55 = vsub.f32 %v4439_v4, %v4448_v22 }
 0x1bc   :  { %2962 = vmatpush3.msra.mxu1 %v4169_v18  ;;  %2920 = vmatprep.subr.mxu0 %v4937_v56  ;;  %v1886_v18 = vsub.f32 %v4351_v61, %v4371_v42  ;;  %v1900_v23 = vsub.f32 %v4364_v51, %v4384_v41  ;;  %v1921_v33 = vsub.f32 %v4378_v29, %v4407_v1 }
 0x1bd   :  { %2964 = vmatmul.mubr.f32.vlgmr.msra.gmra.mxu1 %v4203_v30  ;;  %2921 = vmatpush3.msra.mxu0 %v4937_v56  ;;  %v4460_v56 = vand.u32 4294901760, %v4451_v27  ;;  %v1943_v39 = vand.u32 4294901760, %v1942_v55 }
 0x1be   :  { %2922 = vmatprep.subr.mxu0 %v4938_v35  ;;  %v1887_v2 = vand.u32 4294901760, %v1886_v18  ;;  %v1901_v0 = vand.u32 4294901760, %v1900_v23  ;;  %v1922_v25 = vand.u32 4294901760, %v1921_v33  ;;  %v4485_v23 = vand.u32 4294901760, %v1760_v16 }
 0x1bf   :  { %2923 = vmatpush3.msra.mxu0 %v4938_v35  ;;  %4943 = vst [vmem:[#allocation34_spill] sm:$0xff] %v4460_v56  ;;  %v4463_v35 = vsub.f32 %v1763_v34, %v4453_v31  ;;  %v1949_v45 = vsub.f32 %v4451_v27, %v4460_v56 }
 0x1c0   :  { %2924 = vmatprep.subr.mxu0 %v4939_v21  ;;  %3001 = vmatprep.subr.mxu1 %v1887_v2  ;;  %v4496_v15 = vsub.f32 %v1760_v16, %v4485_v23 }
 0x1c1   :  { %2925 = vmatpush3.msra.mxu0 %v4939_v21  ;;  %3002 = vmatpush3.msra.mxu1 %v1887_v2  ;;  %v4466_v21 = vand.u32 4294901760, %v1762_v48  ;;  %v4472_v52 = vand.u32 4294901760, %v4463_v35  ;;  %v1950_v17 = vand.u32 4294901760, %v1949_v45 }
 0x1c2   :  { %2926 = vmatprep.subr.mxu0 %v4940_v57  ;;  %3003 = vmatprep.subr.mxu1 %v1894_v43  ;;  %v4507_v46 = vand.u32 4294901760, %v4496_v15 }
 0x1c3   :  { %2927 = vmatpush3.msra.mxu0 %v4940_v57  ;;  %3004 = vmatpush3.msra.mxu1 %v1894_v43  ;;  %v1761_v57 = vld [vmem:[#allocation8 + $0x18] sm:$0xff]  ;;  %4944 = vst [vmem:[#allocation26_spill] sm:$0xff] %v4472_v52  ;;  %v4477_v10 = vsub.f32 %v1762_v48, %v4466_v21  ;;  %v1956_v18 = vsub.f32 %v4463_v35, %v4472_v52 }
 0x1c4   :  { %2929 = vmatmul.mubr.f32.vlgmr.msra.gmra.mxu0 %v4203_v30  ;;  %2966 = vmatprep.subr.mxu0 %v4342_v40  ;;  %v4429_v30 = vsub.f32 %v1766_v13, %v4424_v12  ;;  %v4474_v9 = vand.u32 4294901760, %v1761_v57  ;;  %v1758_v13 = vld [vmem:[#allocation8] sm:$0xff]  ;;  %4947 = vst [vmem:[#allocation33_spill] sm:$0xff] %v4507_v46  ;;  %v1977_v34 = vsub.f32 %v4496_v15, %v4507_v46 }
 0x1c5   :  { %2967 = vmatpush3.msra.mxu0 %v4342_v40  ;;  %3005 = vmatprep.subr.mxu1 %v1901_v0  ;;  %v4489_v2 = vand.u32 4294901760, %v4477_v10  ;;  %v1957_v43 = vand.u32 4294901760, %v1956_v18 }
 0x1c6   :  { %2968 = vmatprep.subr.mxu0 %v4344_v19  ;;  %3006 = vmatpush3.msra.mxu1 %v1901_v0  ;;  %v4436_v50 = vand.u32 4294901760, %v4429_v30  ;;  %v4483_v32 = vsub.f32 %v1761_v57, %v4474_v9 }
 0x1c7   :  { %2969 = vmatpush3.msra.mxu0 %v4344_v19  ;;  %3007 = vmatprep.subr.mxu1 %v1908_v62  ;;  %4945 = vst [vmem:[#allocation35_spill] sm:$0xff] %v4489_v2  ;;  %v1963_v33 = vsub.f32 %v4477_v10, %v4489_v2 }
 0x1c8   :  { %2970 = vmatprep.subr.mxu0 %v4346_v60  ;;  %3008 = vmatpush3.msra.mxu1 %v1908_v62  ;;  %4941 = vst [vmem:[#allocation20_spill] sm:$0xff] %v4436_v50  ;;  %v1935_v7 = vsub.f32 %v4429_v30, %v4436_v50  ;;  %v4493_v0 = vand.u32 4294901760, %v4483_v32  ;;  %v4498_v62 = vand.u32 4294901760, %v1759_v28 }
 0x1c9   :  { %2971 = vmatpush3.msra.mxu0 %v4346_v60  ;;  %3009 = vmatprep.subr.mxu1 %v1915_v49  ;;  %v1964_v44 = vand.u32 4294901760, %v1963_v33 }
 0x1ca   :  { %2972 = vmatprep.subr.mxu0 %v4348_v6  ;;  %3010 = vmatpush3.msra.mxu1 %v1915_v49  ;;  %v1936_v14 = vand.u32 4294901760, %v1935_v7  ;;  %4946 = vst [vmem:[#allocation27_spill] sm:$0xff] %v4493_v0  ;;  %v1970_v49 = vsub.f32 %v4483_v32, %v4493_v0  ;;  %v4510_v24 = vsub.f32 %v1759_v28, %v4498_v62  ;;  %v4538_v28 = vpop.f32.mrf.mxu1 }
 0x1cb   :  { %2973 = vmatpush3.msra.mxu0 %v4348_v6  ;;  %3011 = vmatprep.subr.mxu1 %v1922_v25  ;;  %4951 = vst [vmem:[#allocation17_spill] sm:$0xff] %v4538_v28 }
 0x1cc   :  { %2974 = vmatprep.subr.mxu0 %v4354_v3  ;;  %3012 = vmatpush3.msra.mxu1 %v1922_v25  ;;  %v4512_v25 = vand.u32 4294901760, %v1758_v13  ;;  %v4519_v7 = vand.u32 4294901760, %v4510_v24 }
 0x1cd   :  { %2975 = vmatpush3.msra.mxu0 %v4354_v3  ;;  %3013 = vmatprep.subr.mxu1 %v1929_v58 }
 0x1ce   :  { %2976 = vmatprep.subr.mxu0 %v4356_v59  ;;  %3014 = vmatpush3.msra.mxu1 %v1929_v58  ;;  %v1971_v58 = vand.u32 4294901760, %v1970_v49  ;;  %4948 = vst [vmem:[#allocation28_spill] sm:$0xff] %v4519_v7  ;;  %v4522_v48 = vsub.f32 %v1758_v13, %v4512_v25  ;;  %v1984_v55 = vsub.f32 %v4510_v24, %v4519_v7 }
 0x1cf   :  { %2977 = vmatpush3.msra.mxu0 %v4356_v59  ;;  %3015 = vmatprep.subr.mxu1 %v1936_v14 }
 0x1d0   :  { %2978 = vmatprep.subr.mxu0 %v4358_v8  ;;  %3016 = vmatpush3.msra.mxu1 %v1936_v14  ;;  %v1978_v14 = vand.u32 4294901760, %v1977_v34  ;;  %v4529_v57 = vand.u32 4294901760, %v4522_v48 }
 0x1d1   :  { %2979 = vmatpush3.msra.mxu0 %v4358_v8  ;;  %3017 = vmatprep.subr.mxu1 %v1943_v39 }
 0x1d2   :  { %2980 = vmatprep.subr.mxu0 %v4424_v12  ;;  %3018 = vmatpush3.msra.mxu1 %v1943_v39  ;;  %4949 = vst [vmem:[#allocation15_spill] sm:$0xff] %v4529_v57  ;;  %v1985_v39 = vand.u32 4294901760, %v1984_v55  ;;  %v1991_v45 = vsub.f32 %v4522_v48, %v4529_v57 }
 0x1d3   :  { %2981 = vmatpush3.msra.mxu0 %v4424_v12  ;;  %3019 = vmatprep.subr.mxu1 %v1950_v17 }
 0x1d4   :  { %2982 = vmatprep.subr.mxu0 %v4431_v36  ;;  %3020 = vmatpush3.msra.mxu1 %v1950_v17  ;;  %v1992_v16 = vand.u32 4294901760, %v1991_v45  ;;  %v4536_v17 = vpop.f32.mrf.mxu0 }
 0x1d5   :  { %2983 = vmatpush3.msra.mxu0 %v4431_v36  ;;  %3021 = vmatprep.subr.mxu1 %v1957_v43  ;;  %4950 = vst [vmem:[#allocation16_spill] sm:$0xff] %v4536_v17 }
 0x1d6   :  { %2984 = vmatprep.subr.mxu0 %v4441_v5  ;;  %3022 = vmatpush3.msra.mxu1 %v1957_v43  ;;  %v2536_v43 = vld [vmem:[%s4716_s4] ss:$0 sm:$0xff] }
 0x1d7   :  { %2985 = vmatpush3.msra.mxu0 %v4441_v5  ;;  %3023 = vmatprep.subr.mxu1 %v1964_v44 }
 0x1d8   :  { %2986 = vmatprep.subr.mxu0 %v4453_v31  ;;  %3024 = vmatpush3.msra.mxu1 %v1964_v44 }
 0x1d9   :  { %2987 = vmatpush3.msra.mxu0 %v4453_v31  ;;  %3025 = vmatprep.subr.mxu1 %v1971_v58 }
 0x1da   :  { %2988 = vmatprep.subr.mxu0 %v4466_v21  ;;  %3026 = vmatpush3.msra.mxu1 %v1971_v58 }
 0x1db   :  { %2989 = vmatpush3.msra.mxu0 %v4466_v21  ;;  %3027 = vmatprep.subr.mxu1 %v1978_v14 }
 0x1dc   :  { %2990 = vmatprep.subr.mxu0 %v4474_v9  ;;  %3028 = vmatpush3.msra.mxu1 %v1978_v14 }
 0x1dd   :  { %2991 = vmatpush3.msra.mxu0 %v4474_v9  ;;  %3029 = vmatprep.subr.mxu1 %v1985_v39 }
 0x1de   :  { %2992 = vmatprep.subr.mxu0 %v4485_v23  ;;  %3030 = vmatpush3.msra.mxu1 %v1985_v39 }
 0x1df   :  { %2993 = vmatpush3.msra.mxu0 %v4485_v23  ;;  %3031 = vmatprep.subr.mxu1 %v1992_v16 }
 0x1e0   :  { %2994 = vmatprep.subr.mxu0 %v4498_v62  ;;  %3032 = vmatpush3.msra.mxu1 %v1992_v16 }
 0x1e1   :  { %2995 = vmatpush3.msra.mxu0 %v4498_v62  ;;  %3071 = vmatprep.subr.mxu1 %v4342_v40 }
 0x1e2   :  { %2996 = vmatprep.subr.mxu0 %v4512_v25 }
 0x1e3   :  { %2997 = vmatpush3.msra.mxu0 %v4512_v25 }
 0x1e4   :  { %3036 = vmatprep.subr.mxu0 %v4351_v61 }
 0x23a   :  { %v2825_v33 = vpop.f32.mrf.mxu1 }
 0x23c   :  { %v1320_v34 = vpop.f32.mrf.mxu1 }
 0x242   :  { %v2790_v18 = vpop.f32.mrf.mxu0 }
 0x243   :  { %v1170_v49 = vadd.f32 %v2790_v18, %v2536_v43 }
 0x244   :  { %v1159_v13 = vpop.f32.mrf.mxu0 }
 0x245   :  { %v1160_v58 = vadd.f32 %v2536_v43, %v1159_v13  ;;  %v1327_v14 = vadd.f32 %v2825_v33, %v1170_v49 }
 0x247   :  { %v1321_v16 = vadd.f32 %v1320_v34, %v1160_v58 }
 0x25b   :  { %v2895_v55 = vpop.f32.mrf.mxu1 }
 0x25d   :  { %v1526_v17 = vpop.f32.mrf.mxu1 }
 0x263   :  { %v2860_v44 = vpop.f32.mrf.mxu0 }
 0x264   :  { %v1438_v45 = vadd.f32 %v2860_v44, %v1327_v14 }
 0x265   :  { %v1430_v39 = vpop.f32.mrf.mxu0 }
 0x266   :  { %v1431_v54 = vadd.f32 %v1430_v39, %v1321_v16  ;;  %v1535_v57 = vadd.f32 %v2895_v55, %v1438_v45 }
 0x268   :  { %v1527_v0 = vadd.f32 %v1526_v17, %v1431_v54 }
 0x27d   :  { %v2965_v7 = vpop.f32.mrf.mxu1 }
 0x27f   :  { %v1746_v22 = vpop.f32.mrf.mxu1 }
 0x284   :  { %v2930_v28 = vpop.f32.mrf.mxu0 }
 0x285   :  { %v1660_v46 = vadd.f32 %v2930_v28, %v1535_v57 }
 0x286   :  { %v1653_v2 = vpop.f32.mrf.mxu0 }
 0x287   :  { %v1753_v52 = vadd.f32 %v2965_v7, %v1660_v46  ;;  %v1654_v56 = vadd.f32 %v1653_v2, %v1527_v0  ;;  %v4963_v2 = vld [vmem:[#allocation17_spill] sm:$0xff]  ;;  %v4964_v46 = vld [vmem:[#allocation32_spill] sm:$0xff] }
 0x289   :  { %v1757_v18 = vmax.f32 %v1753_v52, 0.0  ;;  %v1747_v50 = vadd.f32 %v1746_v22, %v1654_v56 }
 0x28b   :  { %v4543_v43 = vand.u32 4294901760, %v1757_v18  ;;  %v1756_v33 = vmax.f32 %v1747_v50, 0.0 }
 0x28d   :  { %v4546_v13 = vsub.f32 %v1757_v18, %v4543_v43  ;;  %v4548_v49 = vand.u32 4294901760, %v1756_v33 }
 0x28f   :  { %v1874_v44 = vand.u32 4294901760, %v4546_v13  ;;  %v1863_v58 = vsub.f32 %v1756_v33, %v4548_v49  ;;  %3033 = vmatprep.mubr.f32.mxu1 %v4548_v49 }
 0x290   :  { %3034 = vmatmul.mubr.f32.vlgmr.msra.gmra.mxu1 %v4543_v43 }
 0x291   :  { %3072 = vmatpush3.msra.mxu1 %v4342_v40  ;;  %v1864_v54 = vand.u32 4294901760, %v1863_v58  ;;  %v1875_v50 = vsub.f32 %v4546_v13, %v1874_v44 }
 0x292   :  { %3073 = vmatprep.subr.mxu1 %v4344_v19 }
 0x293   :  { %3074 = vmatpush3.msra.mxu1 %v4344_v19  ;;  %3103 = vmatprep.mubr.f32.mxu1 %v1864_v54  ;;  %v1865_v22 = vsub.f32 %v1863_v58, %v1864_v54  ;;  %v1876_v52 = vand.u32 4294901760, %v1875_v50 }
 0x294   :  { %3075 = vmatprep.subr.mxu1 %v4346_v60 }
 0x295   :  { %3076 = vmatpush3.msra.mxu1 %v4346_v60  ;;  %v1866_v56 = vand.u32 4294901760, %v1865_v22 }
 0x296   :  { %3077 = vmatprep.subr.mxu1 %v4348_v6 }
 0x297   :  { %3078 = vmatpush3.msra.mxu1 %v4348_v6  ;;  %2998 = vmatprep.mubr.f32.mxu0 %v1866_v56 }
 0x298   :  { %3079 = vmatprep.subr.mxu1 %v4354_v3  ;;  %2999 = vmatmul.mubr.f32.vlgmr.msra.gmra.mxu0 %v1876_v52 }
 0x299   :  { %3037 = vmatpush3.msra.mxu0 %v4351_v61  ;;  %3080 = vmatpush3.msra.mxu1 %v4354_v3  ;;  %v4956_v61 = vld [vmem:[#allocation35_spill] sm:$0xff] }
 0x29a   :  { %3038 = vmatprep.subr.mxu0 %v4361_v63  ;;  %3068 = vmatprep.mubr.f32.mxu0 %v1863_v58 }
 0x29b   :  { %3081 = vmatprep.subr.mxu1 %v4356_v59  ;;  %3039 = vmatpush3.msra.mxu0 %v4361_v63  ;;  %v4960_v63 = vld [vmem:[#allocation15_spill] sm:$0xff] }
 0x29c   :  { %3082 = vmatpush3.msra.mxu1 %v4356_v59  ;;  %3040 = vmatprep.subr.mxu0 %v4364_v51 }
 0x29d   :  { %3083 = vmatprep.subr.mxu1 %v4358_v8  ;;  %3041 = vmatpush3.msra.mxu0 %v4364_v51 }
 0x29e   :  { %3084 = vmatpush3.msra.mxu1 %v4358_v8  ;;  %3042 = vmatprep.subr.mxu0 %v4367_v37 }
 0x29f   :  { %3085 = vmatprep.subr.mxu1 %v4424_v12  ;;  %3043 = vmatpush3.msra.mxu0 %v4367_v37  ;;  %v2537_v37 = vld [vmem:[%s4718_s6] ss:$0 sm:$0xff] }
 0x2a0   :  { %3086 = vmatpush3.msra.mxu1 %v4424_v12  ;;  %3044 = vmatprep.subr.mxu0 %v4374_v47 }
 0x2a1   :  { %3087 = vmatprep.subr.mxu1 %v4431_v36  ;;  %3045 = vmatpush3.msra.mxu0 %v4374_v47 }
 0x2a2   :  { %3088 = vmatpush3.msra.mxu1 %v4431_v36  ;;  %3046 = vmatprep.subr.mxu0 %v4378_v29 }
 0x2a3   :  { %3089 = vmatprep.subr.mxu1 %v4441_v5  ;;  %3047 = vmatpush3.msra.mxu0 %v4378_v29 }
 0x2a4   :  { %3090 = vmatpush3.msra.mxu1 %v4441_v5  ;;  %3048 = vmatprep.subr.mxu0 %v4397_v26 }
 0x2a5   :  { %3091 = vmatprep.subr.mxu1 %v4453_v31  ;;  %3049 = vmatpush3.msra.mxu0 %v4397_v26 }
 0x2a6   :  { %3092 = vmatpush3.msra.mxu1 %v4453_v31  ;;  %3050 = vmatprep.subr.mxu0 %v4429_v30 }
 0x2a7   :  { %3093 = vmatprep.subr.mxu1 %v4466_v21  ;;  %3051 = vmatpush3.msra.mxu0 %v4429_v30 }
 0x2a8   :  { %3094 = vmatpush3.msra.mxu1 %v4466_v21  ;;  %3052 = vmatprep.subr.mxu0 %v4439_v4 }
 0x2a9   :  { %3095 = vmatprep.subr.mxu1 %v4474_v9  ;;  %3053 = vmatpush3.msra.mxu0 %v4439_v4 }
 0x2aa   :  { %3096 = vmatpush3.msra.mxu1 %v4474_v9  ;;  %3054 = vmatprep.subr.mxu0 %v4451_v27 }
 0x2ab   :  { %3097 = vmatprep.subr.mxu1 %v4485_v23  ;;  %3055 = vmatpush3.msra.mxu0 %v4451_v27 }
 0x2ac   :  { %3098 = vmatpush3.msra.mxu1 %v4485_v23  ;;  %3056 = vmatprep.subr.mxu0 %v4463_v35 }
 0x2ad   :  { %3099 = vmatprep.subr.mxu1 %v4498_v62  ;;  %3057 = vmatpush3.msra.mxu0 %v4463_v35  ;;  %v4962_v35 = vld [vmem:[#allocation16_spill] sm:$0xff] }
 0x2ae   :  { %3100 = vmatpush3.msra.mxu1 %v4498_v62  ;;  %3058 = vmatprep.subr.mxu0 %v4477_v10 }
 0x2af   :  { %3101 = vmatprep.subr.mxu1 %v4512_v25  ;;  %3059 = vmatpush3.msra.mxu0 %v4477_v10 }
 0x2b0   :  { %3102 = vmatpush3.msra.mxu1 %v4512_v25  ;;  %3060 = vmatprep.subr.mxu0 %v4483_v32 }
 0x2b1   :  { %3104 = vmatmul.mubr.f32.vlgmr.msra.gmra.mxu1 %v1874_v44  ;;  %3141 = vmatprep.subr.mxu1 %v4342_v40 }
 0x2b2   :  { %3061 = vmatpush3.msra.mxu0 %v4483_v32  ;;  %3142 = vmatpush3.msra.mxu1 %v4342_v40  ;;  %v4952_v40 = vld [vmem:[#allocation20_spill] sm:$0xff]  ;;  %v2535_v32 = vld [vmem:[%s4719_s7] ss:$0 sm:$0xff] }
 0x2b3   :  { %3173 = vmatprep.mubr.f32.mxu1 %v4548_v49  ;;  %3062 = vmatprep.subr.mxu0 %v4496_v15 }
 0x2b4   :  { %3143 = vmatprep.subr.mxu1 %v4344_v19  ;;  %3063 = vmatpush3.msra.mxu0 %v4496_v15 }
 0x2b5   :  { %3144 = vmatpush3.msra.mxu1 %v4344_v19  ;;  %3064 = vmatprep.subr.mxu0 %v4510_v24  ;;  %v4953_v19 = vld [vmem:[#allocation25_spill] sm:$0xff] }
 0x2b6   :  { %3145 = vmatprep.subr.mxu1 %v4346_v60  ;;  %3065 = vmatpush3.msra.mxu0 %v4510_v24  ;;  %v1047_v24 = vadd.f32 %v2535_v32, %v4964_v46 }
 0x2b7   :  { %3146 = vmatpush3.msra.mxu1 %v4346_v60  ;;  %3066 = vmatprep.subr.mxu0 %v4522_v48  ;;  %v4954_v60 = vld [vmem:[#allocation34_spill] sm:$0xff] }
 0x2b8   :  { %3147 = vmatprep.subr.mxu1 %v4348_v6  ;;  %3067 = vmatpush3.msra.mxu0 %v4522_v48 }
 0x2b9   :  { %3148 = vmatpush3.msra.mxu1 %v4348_v6  ;;  %3069 = vmatmul.mubr.f32.vlgmr.msra.gmra.mxu0 %v4546_v13  ;;  %v4955_v6 = vld [vmem:[#allocation26_spill] sm:$0xff] }
 0x2ba   :  { %3106 = vmatprep.subr.mxu0 %v4371_v42  ;;  %3149 = vmatprep.subr.mxu1 %v4354_v3 }
 0x2bb   :  { %3107 = vmatpush3.msra.mxu0 %v4371_v42  ;;  %3138 = vmatprep.mubr.f32.mxu0 %v4548_v49 }
 0x2bc   :  { %3150 = vmatpush3.msra.mxu1 %v4354_v3  ;;  %3108 = vmatprep.subr.mxu0 %v4381_v20  ;;  %v4957_v3 = vld [vmem:[#allocation27_spill] sm:$0xff] }
 0x2bd   :  { %3151 = vmatprep.subr.mxu1 %v4356_v59  ;;  %3109 = vmatpush3.msra.mxu0 %v4381_v20 }
 0x2be   :  { %3152 = vmatpush3.msra.mxu1 %v4356_v59  ;;  %3110 = vmatprep.subr.mxu0 %v4384_v41  ;;  %v4958_v59 = vld [vmem:[#allocation33_spill] sm:$0xff] }
 0x2bf   :  { %3153 = vmatprep.subr.mxu1 %v4358_v8  ;;  %3111 = vmatpush3.msra.mxu0 %v4384_v41 }
 0x2c0   :  { %3154 = vmatpush3.msra.mxu1 %v4358_v8  ;;  %3112 = vmatprep.subr.mxu0 %v4387_v11  ;;  %v4959_v8 = vld [vmem:[#allocation28_spill] sm:$0xff] }
 0x2c1   :  { %3155 = vmatprep.subr.mxu1 %v4424_v12  ;;  %3113 = vmatpush3.msra.mxu0 %v4387_v11 }
 0x2c2   :  { %3156 = vmatpush3.msra.mxu1 %v4424_v12  ;;  %3114 = vmatprep.subr.mxu0 %v4393_v53 }
 0x2c3   :  { %3157 = vmatprep.subr.mxu1 %v4431_v36  ;;  %3115 = vmatpush3.msra.mxu0 %v4393_v53 }
 0x2c4   :  { %3158 = vmatpush3.msra.mxu1 %v4431_v36  ;;  %3116 = vmatprep.subr.mxu0 %v4407_v1 }
 0x2c5   :  { %3159 = vmatprep.subr.mxu1 %v4441_v5  ;;  %3117 = vmatpush3.msra.mxu0 %v4407_v1 }
 0x2c6   :  { %3160 = vmatpush3.msra.mxu1 %v4441_v5  ;;  %3118 = vmatprep.subr.mxu0 %v4414_v38 }
 0x2c7   :  { %3161 = vmatprep.subr.mxu1 %v4453_v31  ;;  %3119 = vmatpush3.msra.mxu0 %v4414_v38 }
 0x2c8   :  { %3162 = vmatpush3.msra.mxu1 %v4453_v31  ;;  %3120 = vmatprep.subr.mxu0 %v4952_v40  ;;  %v4961_v31 = vld [vmem:[#allocation31_spill] sm:$0xff] }
 0x2c9   :  { %3163 = vmatprep.subr.mxu1 %v4466_v21  ;;  %3121 = vmatpush3.msra.mxu0 %v4952_v40 }
 0x2ca   :  { %3164 = vmatpush3.msra.mxu1 %v4466_v21  ;;  %3122 = vmatprep.subr.mxu0 %v4953_v19  ;;  %v916_v21 = vadd.f32 %v4962_v35, %v4961_v31 }
 0x2cb   :  { %3165 = vmatprep.subr.mxu1 %v4474_v9  ;;  %3123 = vmatpush3.msra.mxu0 %v4953_v19  ;;  %v2538_v19 = vld [vmem:[%s4720_s8] ss:$0 sm:$0xff] }
 0x2cc   :  { %3166 = vmatpush3.msra.mxu1 %v4474_v9  ;;  %3124 = vmatprep.subr.mxu0 %v4954_v60  ;;  %v1027_v0 = vadd.f32 %v4963_v2, %v916_v21 }
 0x2cd   :  { %3167 = vmatprep.subr.mxu1 %v4485_v23  ;;  %3125 = vmatpush3.msra.mxu0 %v4954_v60 }
 0x2ce   :  { %3168 = vmatpush3.msra.mxu1 %v4485_v23  ;;  %3126 = vmatprep.subr.mxu0 %v4955_v6  ;;  %v1048_v48 = vadd.f32 %v2535_v32, %v1027_v0 }
 0x2cf   :  { %3169 = vmatprep.subr.mxu1 %v4498_v62  ;;  %3127 = vmatpush3.msra.mxu0 %v4955_v6  ;;  %v2539_v6 = vld [vmem:[%s4721_s9] ss:$0 sm:$0xff] }
 0x2d0   :  { %3170 = vmatpush3.msra.mxu1 %v4498_v62  ;;  %3128 = vmatprep.subr.mxu0 %v4956_v61 }
 0x2d1   :  { %3171 = vmatprep.subr.mxu1 %v4512_v25  ;;  %3129 = vmatpush3.msra.mxu0 %v4956_v61 }
 0x2d2   :  { %3172 = vmatpush3.msra.mxu1 %v4512_v25  ;;  %3130 = vmatprep.subr.mxu0 %v4957_v3 }
 0x2d3   :  { %3174 = vmatmul.mubr.f32.vlgmr.msra.gmra.mxu1 %v4543_v43  ;;  %3131 = vmatpush3.msra.mxu0 %v4957_v3 }
 0x2d4   :  { %3132 = vmatprep.subr.mxu0 %v4958_v59 }
 0x2d5   :  { %3133 = vmatpush3.msra.mxu0 %v4958_v59 }
 0x2d6   :  { %3134 = vmatprep.subr.mxu0 %v4959_v8 }
 0x2d7   :  { %3135 = vmatpush3.msra.mxu0 %v4959_v8 }
 0x2d8   :  { %3136 = vmatprep.subr.mxu0 %v4960_v63 }
 0x2d9   :  { %3137 = vmatpush3.msra.mxu0 %v4960_v63 }
 0x2da   :  { %3139 = vmatmul.mubr.f32.vlgmr.msra.gmra.mxu0 %v4543_v43 }
 0x350   :  { %v3035_v42 = vpop.f32.mrf.mxu1 }
 0x352   :  { %v2029_v11 = vpop.f32.mrf.mxu1 }
 0x358   :  { %v3000_v51 = vpop.f32.mrf.mxu0 }
 0x359   :  { %v1879_v29 = vadd.f32 %v3000_v51, %v2537_v37 }
 0x35a   :  { %v1868_v47 = vpop.f32.mrf.mxu0 }
 0x35b   :  { %v1869_v41 = vadd.f32 %v2537_v37, %v1868_v47  ;;  %v2036_v53 = vadd.f32 %v3035_v42, %v1879_v29 }
 0x35d   :  { %v2030_v12 = vadd.f32 %v2029_v11, %v1869_v41 }
 0x371   :  { %v3105_v26 = vpop.f32.mrf.mxu1 }
 0x373   :  { %v2235_v36 = vpop.f32.mrf.mxu1 }
 0x379   :  { %v3070_v20 = vpop.f32.mrf.mxu0 }
 0x37a   :  { %v2147_v38 = vadd.f32 %v3070_v20, %v2036_v53 }
 0x37b   :  { %v2139_v1 = vpop.f32.mrf.mxu0 }
 0x37c   :  { %v2140_v30 = vadd.f32 %v2139_v1, %v2030_v12  ;;  %v2244_v4 = vadd.f32 %v3105_v26, %v2147_v38 }
 0x37e   :  { %v2236_v10 = vadd.f32 %v2235_v36, %v2140_v30 }
 0x393   :  { %v3175_v5 = vpop.f32.mrf.mxu1 }
 0x395   :  { %v2455_v62 = vpop.f32.mrf.mxu1 }
 0x39a   :  { %v3140_v27 = vpop.f32.mrf.mxu0 }
 0x39b   :  { %v2369_v9 = vadd.f32 %v3140_v27, %v2244_v4 }
 0x39c   :  { %v2362_v23 = vpop.f32.mrf.mxu0 }
 0x39d   :  { %v2363_v15 = vadd.f32 %v2362_v23, %v2236_v10  ;;  %v2462_v25 = vadd.f32 %v3175_v5, %v2369_v9 }
 0x39f   :  { %v2456_v7 = vadd.f32 %v2455_v62, %v2363_v15  ;;  %v2466_v28 = vadd.f32 %v2462_v25, %v1048_v48 }
 0x3a1   :  { %v2465_v57 = vadd.f32 %v2456_v7, %v1047_v24  ;;  %v2472_v34 = vmul.f32 %v2466_v28, %v2466_v28 }
 0x3a3   :  { %2467 = vadd.xlane.f32.xlu0 %v2465_v57  ;;  %v2471_v17 = vmul.f32 %v2465_v57, %v2465_v57 }
 0x3a5   :  { %2473 = vadd.xlane.f32.xlu1 %v2471_v17 }
 0x3a7   :  { %2469 = vadd.xlane.f32.xlu0 %v2466_v28 }
 0x3a9   :  { %2475 = vadd.xlane.f32.xlu1 %v2472_v34 }
 0x42c   :  { %v2468_v14 = vpop.xlane.xlu0 %2467 }
 0x42d   :  { %v2477_v55 = vmul.f32 0.0625, %v2468_v14 }
 0x42e   :  { %v2474_v39 = vpop.xlane.xlu1 %2473 }
 0x42f   :  { %v2481_v45 = vmul.f32 %v2477_v55, %v2477_v55  ;;  %v2479_v16 = vmul.f32 0.0625, %v2474_v39  ;;  %v2487_v52 = vsub.f32 %v2465_v57, %v2477_v55 }
 0x430   :  { %v2470_v18 = vpop.xlane.xlu0 %2469 }
 0x431   :  { %v2483_v43 = vsub.f32 %v2479_v16, %v2481_v45  ;;  %v2478_v33 = vmul.f32 0.0625, %v2470_v18 }
 0x432   :  { %v2476_v13 = vpop.xlane.xlu1 %2475 }
 0x433   :  { %v2485_v49 = vmax.f32 %v2483_v43, 0.0  ;;  %v2482_v44 = vmul.f32 %v2478_v33, %v2478_v33  ;;  %v2480_v58 = vmul.f32 0.0625, %v2476_v13  ;;  %v2488_v61 = vsub.f32 %v2466_v28, %v2478_v33 }
 0x435   :  { %v2489_v54 = vadd.f32 1e-05, %v2485_v49  ;;  %v2484_v50 = vsub.f32 %v2480_v58, %v2482_v44 }
 0x437   :  { %3186 = vrsqrt.f32 %v2489_v54  ;;  %v2486_v22 = vmax.f32 %v2484_v50, 0.0 }
 0x439   :  { %v2490_v56 = vadd.f32 1e-05, %v2486_v22 }
 0x43b   :  { %3188 = vrsqrt.f32 %v2490_v56 }
 0x444   :  { %v3187_v40 = vpop.eup %3186 }
 0x445   :  { %v2493_v60 = vmul.f32 %v3187_v40, %v2487_v52 }
 0x447   :  { %v2502_v3 = vmul.f32 %v2538_v19, %v2493_v60 }
 0x448   :  { %v3189_v59 = vpop.eup %3188 }
 0x449   :  { %v2494_v8 = vmul.f32 %v3189_v59, %v2488_v61  ;;  %v2511_v63 = vadd.f32 %v2539_v6, %v2502_v3 }
 0x44b   :  { %v2503_v51 = vmul.f32 %v2538_v19, %v2494_v8  ;;  %2513 = vst [vmem:[#allocation10] sm:$0xff] %v2511_v63 }
 0x44d   :  { %v2512_v37 = vadd.f32 %v2539_v6, %v2503_v51 }
 0x44f   :  { %2514 = vst [vmem:[#allocation10 + $0x8] sm:$0xff] %v2512_v37 }
 0x450   :  { %3281 = shalt.err (!%p3278_p10)
}
 0x451   :  { %2526 = dma.vmem_to_hbm [thread:$0]  %s2521_s22, 256, %s4722_s10, [#allocation4], %s3302_s23, %s3302_s23, %s3303_s24  }
 0x452   :  { %3296 = dma.done.wait [#allocation4], 256  }
 0x453   :  { %3297 = vsyncadd [#allocation4], 4294967040 }
 0x454   :  { %2530 = vsyncpa [#allocation3], 1 }
 0x455   :  { %2531 = vsyncpa [#allocation6], 1 }
 0x456   :  { %2532 = vsyncpa [#allocation9], 1 }
 0x457   :  { %2533 = vsyncpa [#allocation4], 1 }

</bundles_post_ra>
